<compile_context>
chip_gen: v7x
topology: tpu7x:2x2x1
jax: 0.10.0
libtpu: 0.0.40
codegen_flags: <defaults>
</compile_context>

<pallas_src>
import functools

import jax
import jax.numpy as jnp
from jax.experimental import pallas as pl
from jax.experimental.pallas import tpu as pltpu


# ----------------------------- fused kernel -----------------------------
def _rrdb_kernel(x_ref, w1_ref, b1_ref, w2_ref, b2_ref, m_ref, a_ref, o_ref,
                 *, img_w):
    """out = x + resblocks(x);  resblock(y) = y + conv2(prelu(conv1(y))).

    x_ref : (1, C, L)        batch-tile of activations, L = B_t * H*W on lanes
    w*_ref: (NB, C, 9*C)     im2col weight slabs, [block, c_out, tap*C + c_in]
    b*_ref: (NB, C, 1)       conv biases
    m_ref : (9*C, L)         f32 {0,1} border masks in stacked tap layout
    a_ref : (NB,)  (SMEM)    PReLU slopes (nn.PReLU(): one slope per block)
    o_ref : (1, C, L)        output tile
    """
    L = x_ref.shape[2]
    NB = w1_ref.shape[0]
    W = img_w

    x0 = x_ref[0].astype(jnp.float32)          # (C, L)
    mask = m_ref[...]                          # (9C, L), loaded once, reused by all 6 convs

    # Static lane shifts for the 9 taps; tap order (ky-major) matches weights & masks.
    shifts = [((-((ky - 1) * W + (kx - 1))) % L)
              for ky in range(3) for kx in range(3)]

    def conv3x3(y, w_ref, b_ref, blk):
        # im2col: 8 XLU rolls + 1 sublane concat + 1 masked multiply + 1 MXU matmul.
        taps = [y if s == 0 else pltpu.roll(y, shift=s, axis=1) for s in shifts]
        stack = jnp.concatenate(taps, axis=0) * mask            # (9C, L)
        return (jnp.dot(w_ref[blk], stack,
                        preferred_element_type=jnp.float32)     # (C, 9C) @ (9C, L)
                + b_ref[blk])                                    # (C, 1) broadcast

    y = x0
    for blk in range(NB):
        alpha = a_ref[blk]                                       # scalar from SMEM
        h = conv3x3(y, w1_ref, b1_ref, blk)
        h = jnp.where(h > 0, h, h * alpha)                       # PReLU (single slope)
        h = conv3x3(h, w2_ref, b2_ref, blk)
        y = y + h                                                # inner residual
    o_ref[0] = (x0 + y).astype(o_ref.dtype)                      # outer RRDB skip


# ----------------------------- wrapper -----------------------------
def _choose_batch_tile(n, hw, target_lanes=2048):
    """Grow the lane axis up to ~target_lanes, but keep >=2 grid steps (v7x: 2 TCs)."""
    cap = max(1, target_lanes // hw)
    if n <= 1:
        return 1
    return max(1, min(cap, (n + 1) // 2))


def _make_tap_masks(bt, h, w, c):
    """Exact integer border masks, pre-broadcast to the stacked (9*C, bt*H*W) layout."""
    hw = h * w
    row = jnp.tile(jnp.repeat(jnp.arange(h, dtype=jnp.int32), w), bt)   # (bt*hw,)
    col = jnp.tile(jnp.arange(w, dtype=jnp.int32), bt * h)              # (bt*hw,)
    pieces = []
    for ky in range(3):
        for kx in range(3):
            dy, dx = ky - 1, kx - 1
            m = jnp.ones((bt * hw,), bool)
            if dy == -1:
                m = m & (row > 0)
            elif dy == 1:
                m = m & (row < h - 1)
            if dx == -1:
                m = m & (col > 0)
            elif dx == 1:
                m = m & (col < w - 1)
            pieces.append(jnp.broadcast_to(m.astype(jnp.float32)[None, :],
                                           (c, bt * hw)))
    return jnp.concatenate(pieces, axis=0)                               # (9*C, bt*hw)


def rrdb_forward(x_nchw, blocks_params):
    """RRDB.forward for PyTorch-layout input (N, C, H, W), OIHW conv weights."""
    N, C, H, W = x_nchw.shape
    HW = H * W
    NB = len(blocks_params)

    bt = _choose_batch_tile(N, HW)
    n_tiles = -(-N // bt)
    Np = n_tiles * bt
    L = bt * HW

    x = x_nchw.reshape(N, C, HW)
    if Np != N:                                   # pad batch to a multiple of the tile
        x = jnp.concatenate([x, jnp.zeros((Np - N, C, HW), x.dtype)], axis=0)
    # (Np, C, HW) -> (n_tiles, C, bt*HW): images of one tile contiguous on the lane axis.
    x_lay = jnp.transpose(x.reshape(n_tiles, bt, C, HW), (0, 2, 1, 3)).reshape(n_tiles, C, L)

    # OIHW (C,C,3,3) -> im2col slab (C, 9*C): slab[c_out, (ky*3+kx)*C + c_in]
    w1 = jnp.stack([jnp.transpose(p[0], (0, 2, 3, 1)).reshape(C, 9 * C)
                    for p in blocks_params])
    b1 = jnp.stack([p[1].reshape(C, 1) for p in blocks_params])
    al = jnp.stack([jnp.asarray(p[2], jnp.float32).reshape(()) for p in blocks_params])  # (NB,)
    w2 = jnp.stack([jnp.transpose(p[3], (0, 2, 3, 1)).reshape(C, 9 * C)
                    for p in blocks_params])
    b2 = jnp.stack([p[4].reshape(C, 1) for p in blocks_params])

    masks = _make_tap_masks(bt, H, W, C)          # (9*C, L), grid-invariant

    kernel = functools.partial(_rrdb_kernel, img_w=W)

    out = pl.pallas_call(
        kernel,
        out_shape=jax.ShapeDtypeStruct((n_tiles, C, L), x_nchw.dtype),
        grid_spec=pltpu.PrefetchScalarGridSpec(
            num_scalar_prefetch=0,
            grid=(n_tiles,),
            in_specs=[
                pl.BlockSpec((1, C, L), lambda n: (n, 0, 0)),            # x tile
                pl.BlockSpec((NB, C, 9 * C), lambda n: (0, 0, 0)),       # w1 slabs (invariant)
                pl.BlockSpec((NB, C, 1), lambda n: (0, 0, 0)),           # b1
                pl.BlockSpec((NB, C, 9 * C), lambda n: (0, 0, 0)),       # w2 slabs
                pl.BlockSpec((NB, C, 1), lambda n: (0, 0, 0)),           # b2
                pl.BlockSpec((9 * C, L), lambda n: (0, 0)),              # border masks
                pl.BlockSpec(memory_space=pltpu.MemorySpace.SMEM),       # PReLU slopes
            ],
            out_specs=pl.BlockSpec((1, C, L), lambda n: (n, 0, 0)),
        ),
        compiler_params=pltpu.CompilerParams(dimension_semantics=("parallel",)),
    )(x_lay, w1, b1, w2, b2, masks, al)

    out = jnp.transpose(out.reshape(n_tiles, C, bt, HW), (0, 2, 1, 3)).reshape(Np, C, H, W)
    return out[:N]


# ---------------- pure-JAX reference (for verification only) ----------------
def _conv3x3_ref(x, w, b):
    y = jax.lax.conv_general_dilated(
        x, w, window_strides=(1, 1), padding="SAME",
        dimension_numbers=("NCHW", "OIHW", "NCHW"))
    return y + b.reshape(1, -1, 1, 1)


def rrdb_ref(x, blocks_params):
    y = x
    for (w1, b1, alpha, w2, b2) in blocks_params:
        h = _conv3x3_ref(y, w1, b1)
        h = jnp.where(h > 0, h, alpha * h)                    # PReLU, single slope
        h = _conv3x3_ref(h, w2, b2)
        y = y + h
    return x + y


# ---------------- deterministic synthetic parameters (PyTorch OIHW) ----------------
def init_params(key, C, num_dense_layers=3):
    params = []
    for _ in range(num_dense_layers):
        key, k1, k2, k3, k4 = jax.random.split(key, 5)
        w1 = jax.random.normal(k1, (C, C, 3, 3), jnp.float32) * 0.1   # OIHW
        b1 = jax.random.normal(k2, (C,), jnp.float32) * 0.05
        w2 = jax.random.normal(k3, (C, C, 3, 3), jnp.float32) * 0.1
        b2 = jax.random.normal(k4, (C,), jnp.float32) * 0.05
        alpha = jnp.float32(0.25)                              # nn.PReLU() default init
        params.append((w1, b1, alpha, w2, b2))
    return params


if __name__ == "__main__":
    key = jax.random.PRNGKey(0)
    kx, kp = jax.random.split(key)

    N, C, H, W = 2, 4, 16, 16                                  # PyTorch NCHW input
    x = jax.random.normal(kx, (N, C, H, W), jnp.float32)
    params = init_params(kp, C, num_dense_layers=3)

    out = jax.jit(lambda a: rrdb_forward(a, params))(x)
    out = jax.block_until_ready(out)

    ref = rrdb_ref(x, params)
    assert out.shape == (N, C, H, W)
    assert out.dtype == jnp.float32
    err = float(jnp.max(jnp.abs(out - ref)))
    assert jnp.allclose(out, ref, atol=1e-4, rtol=1e-4), err
    print("KERNEL_OK")
</pallas_src>

<mosaic_0001>
module attributes {stable_mosaic.version = 11 : i64} {
  func.func @_rrdb_kernel(%arg0: i32, %arg1: memref<1x4x256xf32, #tpu.memory_space<vmem>>, %arg2: memref<3x4x36xf32, #tpu.memory_space<vmem>>, %arg3: memref<3x4x1xf32, #tpu.memory_space<vmem>>, %arg4: memref<3x4x36xf32, #tpu.memory_space<vmem>>, %arg5: memref<3x4x1xf32, #tpu.memory_space<vmem>>, %arg6: memref<36x256xf32, #tpu.memory_space<vmem>>, %arg7: memref<3xf32, #tpu.memory_space<smem>>, %arg8: memref<1x4x256xf32, #tpu.memory_space<vmem>>) attributes {dimension_semantics = [#tpu.dimension_semantics<parallel>], iteration_bounds = array<i64: 2>, scalar_prefetch = 0 : i64, scratch_operands = 0 : i64, tpu.core_type = #tpu.core_type<tc>, window_params = [{transform_indices = @transform_0, window_bounds = array<i64: 1, 4, 256>}, {pipeline_mode = #tpu.pipeline_mode<synchronous>, transform_indices = @transform_1, window_bounds = array<i64: 3, 4, 36>}, {pipeline_mode = #tpu.pipeline_mode<synchronous>, transform_indices = @transform_2, window_bounds = array<i64: 3, 4, 1>}, {pipeline_mode = #tpu.pipeline_mode<synchronous>, transform_indices = @transform_3, window_bounds = array<i64: 3, 4, 36>}, {pipeline_mode = #tpu.pipeline_mode<synchronous>, transform_indices = @transform_4, window_bounds = array<i64: 3, 4, 1>}, {pipeline_mode = #tpu.pipeline_mode<synchronous>, transform_indices = @transform_5, window_bounds = array<i64: 36, 256>}, {transform_indices = @transform_6, window_bounds = array<i64: 3>}, {transform_indices = @transform_7, window_bounds = array<i64: 1, 4, 256>}]} {
    %c0 = arith.constant 0 : index
    %c0_0 = arith.constant 0 : index
    %c0_1 = arith.constant 0 : index
    %0 = vector.load %arg1[%c0, %c0_0, %c0_1] : memref<1x4x256xf32, #tpu.memory_space<vmem>>, vector<1x4x256xf32>
    %1 = vector.shape_cast %0 : vector<1x4x256xf32> to vector<4x256xf32>
    %c0_2 = arith.constant 0 : index
    %c0_3 = arith.constant 0 : index
    %2 = vector.load %arg6[%c0_2, %c0_3] : memref<36x256xf32, #tpu.memory_space<vmem>>, vector<36x256xf32>
    %c0_4 = arith.constant 0 : index
    %3 = memref.load %arg7[%c0_4] : memref<3xf32, #tpu.memory_space<smem>>
    %c17_i32 = arith.constant 17 : i32
    %4 = tpu.dynamic_rotate %1 by %c17_i32 dim 1 : vector<4x256xf32>, i32 -> vector<4x256xf32>
    %c16_i32 = arith.constant 16 : i32
    %5 = tpu.dynamic_rotate %1 by %c16_i32 dim 1 : vector<4x256xf32>, i32 -> vector<4x256xf32>
    %c15_i32 = arith.constant 15 : i32
    %6 = tpu.dynamic_rotate %1 by %c15_i32 dim 1 : vector<4x256xf32>, i32 -> vector<4x256xf32>
    %c1_i32 = arith.constant 1 : i32
    %7 = tpu.dynamic_rotate %1 by %c1_i32 dim 1 : vector<4x256xf32>, i32 -> vector<4x256xf32>
    %c255_i32 = arith.constant 255 : i32
    %8 = tpu.dynamic_rotate %1 by %c255_i32 dim 1 : vector<4x256xf32>, i32 -> vector<4x256xf32>
    %c241_i32 = arith.constant 241 : i32
    %9 = tpu.dynamic_rotate %1 by %c241_i32 dim 1 : vector<4x256xf32>, i32 -> vector<4x256xf32>
    %c240_i32 = arith.constant 240 : i32
    %10 = tpu.dynamic_rotate %1 by %c240_i32 dim 1 : vector<4x256xf32>, i32 -> vector<4x256xf32>
    %c239_i32 = arith.constant 239 : i32
    %11 = tpu.dynamic_rotate %1 by %c239_i32 dim 1 : vector<4x256xf32>, i32 -> vector<4x256xf32>
    %12 = tpu.concatenate %4, %5, %6, %7, %1, %8, %9, %10, %11 in 0 : vector<4x256xf32>, vector<4x256xf32>, vector<4x256xf32>, vector<4x256xf32>, vector<4x256xf32>, vector<4x256xf32>, vector<4x256xf32>, vector<4x256xf32>, vector<4x256xf32> -> vector<36x256xf32>
    %13 = arith.mulf %12, %2 : vector<36x256xf32>
    %c0_5 = arith.constant 0 : index
    %c0_6 = arith.constant 0 : index
    %c0_7 = arith.constant 0 : index
    %14 = vector.load %arg2[%c0_5, %c0_6, %c0_7] : memref<3x4x36xf32, #tpu.memory_space<vmem>>, vector<1x4x36xf32>
    %15 = vector.shape_cast %14 : vector<1x4x36xf32> to vector<4x36xf32>
    %cst = arith.constant dense<0.000000e+00> : vector<4x256xf32>
    %16 = tpu.matmul %15, %13, %cst {dimension_numbers = #tpu.dot_dimension_numbers<[1], [0], [0], [1], [0, 0, 1, 1], [], []>} : vector<4x36xf32>, vector<36x256xf32>, vector<4x256xf32> -> vector<4x256xf32>
    %c0_8 = arith.constant 0 : index
    %c0_9 = arith.constant 0 : index
    %c0_10 = arith.constant 0 : index
    %17 = vector.load %arg3[%c0_8, %c0_9, %c0_10] : memref<3x4x1xf32, #tpu.memory_space<vmem>>, vector<1x4x1xf32>
    %18 = vector.shape_cast %17 : vector<1x4x1xf32> to vector<4x1xf32>
    %19 = vector.broadcast %18 : vector<4x1xf32> to vector<4x256xf32>
    %20 = arith.addf %16, %19 : vector<4x256xf32>
    %cst_11 = arith.constant 0.000000e+00 : f32
    %21 = vector.broadcast %cst_11 : f32 to vector<4x256xf32>
    %22 = arith.cmpf ogt, %20, %21 : vector<4x256xf32>
    %23 = vector.broadcast %3 : f32 to vector<4x256xf32>
    %24 = arith.mulf %20, %23 : vector<4x256xf32>
    %25 = arith.select %22, %20, %24 : vector<4x256xi1>, vector<4x256xf32>
    %c17_i32_12 = arith.constant 17 : i32
    %26 = tpu.dynamic_rotate %25 by %c17_i32_12 dim 1 : vector<4x256xf32>, i32 -> vector<4x256xf32>
    %c16_i32_13 = arith.constant 16 : i32
    %27 = tpu.dynamic_rotate %25 by %c16_i32_13 dim 1 : vector<4x256xf32>, i32 -> vector<4x256xf32>
    %c15_i32_14 = arith.constant 15 : i32
    %28 = tpu.dynamic_rotate %25 by %c15_i32_14 dim 1 : vector<4x256xf32>, i32 -> vector<4x256xf32>
    %c1_i32_15 = arith.constant 1 : i32
    %29 = tpu.dynamic_rotate %25 by %c1_i32_15 dim 1 : vector<4x256xf32>, i32 -> vector<4x256xf32>
    %c255_i32_16 = arith.constant 255 : i32
    %30 = tpu.dynamic_rotate %25 by %c255_i32_16 dim 1 : vector<4x256xf32>, i32 -> vector<4x256xf32>
    %c241_i32_17 = arith.constant 241 : i32
    %31 = tpu.dynamic_rotate %25 by %c241_i32_17 dim 1 : vector<4x256xf32>, i32 -> vector<4x256xf32>
    %c240_i32_18 = arith.constant 240 : i32
    %32 = tpu.dynamic_rotate %25 by %c240_i32_18 dim 1 : vector<4x256xf32>, i32 -> vector<4x256xf32>
    %c239_i32_19 = arith.constant 239 : i32
    %33 = tpu.dynamic_rotate %25 by %c239_i32_19 dim 1 : vector<4x256xf32>, i32 -> vector<4x256xf32>
    %34 = tpu.concatenate %26, %27, %28, %29, %25, %30, %31, %32, %33 in 0 : vector<4x256xf32>, vector<4x256xf32>, vector<4x256xf32>, vector<4x256xf32>, vector<4x256xf32>, vector<4x256xf32>, vector<4x256xf32>, vector<4x256xf32>, vector<4x256xf32> -> vector<36x256xf32>
    %35 = arith.mulf %34, %2 : vector<36x256xf32>
    %c0_20 = arith.constant 0 : index
    %c0_21 = arith.constant 0 : index
    %c0_22 = arith.constant 0 : index
    %36 = vector.load %arg4[%c0_20, %c0_21, %c0_22] : memref<3x4x36xf32, #tpu.memory_space<vmem>>, vector<1x4x36xf32>
    %37 = vector.shape_cast %36 : vector<1x4x36xf32> to vector<4x36xf32>
    %cst_23 = arith.constant dense<0.000000e+00> : vector<4x256xf32>
    %38 = tpu.matmul %37, %35, %cst_23 {dimension_numbers = #tpu.dot_dimension_numbers<[1], [0], [0], [1], [0, 0, 1, 1], [], []>} : vector<4x36xf32>, vector<36x256xf32>, vector<4x256xf32> -> vector<4x256xf32>
    %c0_24 = arith.constant 0 : index
    %c0_25 = arith.constant 0 : index
    %c0_26 = arith.constant 0 : index
    %39 = vector.load %arg5[%c0_24, %c0_25, %c0_26] : memref<3x4x1xf32, #tpu.memory_space<vmem>>, vector<1x4x1xf32>
    %40 = vector.shape_cast %39 : vector<1x4x1xf32> to vector<4x1xf32>
    %41 = vector.broadcast %40 : vector<4x1xf32> to vector<4x256xf32>
    %42 = arith.addf %38, %41 : vector<4x256xf32>
    %43 = arith.addf %1, %42 : vector<4x256xf32>
    %c1 = arith.constant 1 : index
    %44 = memref.load %arg7[%c1] : memref<3xf32, #tpu.memory_space<smem>>
    %c17_i32_27 = arith.constant 17 : i32
    %45 = tpu.dynamic_rotate %43 by %c17_i32_27 dim 1 : vector<4x256xf32>, i32 -> vector<4x256xf32>
    %c16_i32_28 = arith.constant 16 : i32
    %46 = tpu.dynamic_rotate %43 by %c16_i32_28 dim 1 : vector<4x256xf32>, i32 -> vector<4x256xf32>
    %c15_i32_29 = arith.constant 15 : i32
    %47 = tpu.dynamic_rotate %43 by %c15_i32_29 dim 1 : vector<4x256xf32>, i32 -> vector<4x256xf32>
    %c1_i32_30 = arith.constant 1 : i32
    %48 = tpu.dynamic_rotate %43 by %c1_i32_30 dim 1 : vector<4x256xf32>, i32 -> vector<4x256xf32>
    %c255_i32_31 = arith.constant 255 : i32
    %49 = tpu.dynamic_rotate %43 by %c255_i32_31 dim 1 : vector<4x256xf32>, i32 -> vector<4x256xf32>
    %c241_i32_32 = arith.constant 241 : i32
    %50 = tpu.dynamic_rotate %43 by %c241_i32_32 dim 1 : vector<4x256xf32>, i32 -> vector<4x256xf32>
    %c240_i32_33 = arith.constant 240 : i32
    %51 = tpu.dynamic_rotate %43 by %c240_i32_33 dim 1 : vector<4x256xf32>, i32 -> vector<4x256xf32>
    %c239_i32_34 = arith.constant 239 : i32
    %52 = tpu.dynamic_rotate %43 by %c239_i32_34 dim 1 : vector<4x256xf32>, i32 -> vector<4x256xf32>
    %53 = tpu.concatenate %45, %46, %47, %48, %43, %49, %50, %51, %52 in 0 : vector<4x256xf32>, vector<4x256xf32>, vector<4x256xf32>, vector<4x256xf32>, vector<4x256xf32>, vector<4x256xf32>, vector<4x256xf32>, vector<4x256xf32>, vector<4x256xf32> -> vector<36x256xf32>
    %54 = arith.mulf %53, %2 : vector<36x256xf32>
    %c1_35 = arith.constant 1 : index
    %c0_36 = arith.constant 0 : index
    %c0_37 = arith.constant 0 : index
    %55 = vector.load %arg2[%c1_35, %c0_36, %c0_37] : memref<3x4x36xf32, #tpu.memory_space<vmem>>, vector<1x4x36xf32>
    %56 = vector.shape_cast %55 : vector<1x4x36xf32> to vector<4x36xf32>
    %cst_38 = arith.constant dense<0.000000e+00> : vector<4x256xf32>
    %57 = tpu.matmul %56, %54, %cst_38 {dimension_numbers = #tpu.dot_dimension_numbers<[1], [0], [0], [1], [0, 0, 1, 1], [], []>} : vector<4x36xf32>, vector<36x256xf32>, vector<4x256xf32> -> vector<4x256xf32>
    %c1_39 = arith.constant 1 : index
    %c0_40 = arith.constant 0 : index
    %c0_41 = arith.constant 0 : index
    %58 = vector.load %arg3[%c1_39, %c0_40, %c0_41] : memref<3x4x1xf32, #tpu.memory_space<vmem>>, vector<1x4x1xf32>
    %59 = vector.shape_cast %58 : vector<1x4x1xf32> to vector<4x1xf32>
    %60 = vector.broadcast %59 : vector<4x1xf32> to vector<4x256xf32>
    %61 = arith.addf %57, %60 : vector<4x256xf32>
    %cst_42 = arith.constant 0.000000e+00 : f32
    %62 = vector.broadcast %cst_42 : f32 to vector<4x256xf32>
    %63 = arith.cmpf ogt, %61, %62 : vector<4x256xf32>
    %64 = vector.broadcast %44 : f32 to vector<4x256xf32>
    %65 = arith.mulf %61, %64 : vector<4x256xf32>
    %66 = arith.select %63, %61, %65 : vector<4x256xi1>, vector<4x256xf32>
    %c17_i32_43 = arith.constant 17 : i32
    %67 = tpu.dynamic_rotate %66 by %c17_i32_43 dim 1 : vector<4x256xf32>, i32 -> vector<4x256xf32>
    %c16_i32_44 = arith.constant 16 : i32
    %68 = tpu.dynamic_rotate %66 by %c16_i32_44 dim 1 : vector<4x256xf32>, i32 -> vector<4x256xf32>
    %c15_i32_45 = arith.constant 15 : i32
    %69 = tpu.dynamic_rotate %66 by %c15_i32_45 dim 1 : vector<4x256xf32>, i32 -> vector<4x256xf32>
    %c1_i32_46 = arith.constant 1 : i32
    %70 = tpu.dynamic_rotate %66 by %c1_i32_46 dim 1 : vector<4x256xf32>, i32 -> vector<4x256xf32>
    %c255_i32_47 = arith.constant 255 : i32
    %71 = tpu.dynamic_rotate %66 by %c255_i32_47 dim 1 : vector<4x256xf32>, i32 -> vector<4x256xf32>
    %c241_i32_48 = arith.constant 241 : i32
    %72 = tpu.dynamic_rotate %66 by %c241_i32_48 dim 1 : vector<4x256xf32>, i32 -> vector<4x256xf32>
    %c240_i32_49 = arith.constant 240 : i32
    %73 = tpu.dynamic_rotate %66 by %c240_i32_49 dim 1 : vector<4x256xf32>, i32 -> vector<4x256xf32>
    %c239_i32_50 = arith.constant 239 : i32
    %74 = tpu.dynamic_rotate %66 by %c239_i32_50 dim 1 : vector<4x256xf32>, i32 -> vector<4x256xf32>
    %75 = tpu.concatenate %67, %68, %69, %70, %66, %71, %72, %73, %74 in 0 : vector<4x256xf32>, vector<4x256xf32>, vector<4x256xf32>, vector<4x256xf32>, vector<4x256xf32>, vector<4x256xf32>, vector<4x256xf32>, vector<4x256xf32>, vector<4x256xf32> -> vector<36x256xf32>
    %76 = arith.mulf %75, %2 : vector<36x256xf32>
    %c1_51 = arith.constant 1 : index
    %c0_52 = arith.constant 0 : index
    %c0_53 = arith.constant 0 : index
    %77 = vector.load %arg4[%c1_51, %c0_52, %c0_53] : memref<3x4x36xf32, #tpu.memory_space<vmem>>, vector<1x4x36xf32>
    %78 = vector.shape_cast %77 : vector<1x4x36xf32> to vector<4x36xf32>
    %cst_54 = arith.constant dense<0.000000e+00> : vector<4x256xf32>
    %79 = tpu.matmul %78, %76, %cst_54 {dimension_numbers = #tpu.dot_dimension_numbers<[1], [0], [0], [1], [0, 0, 1, 1], [], []>} : vector<4x36xf32>, vector<36x256xf32>, vector<4x256xf32> -> vector<4x256xf32>
    %c1_55 = arith.constant 1 : index
    %c0_56 = arith.constant 0 : index
    %c0_57 = arith.constant 0 : index
    %80 = vector.load %arg5[%c1_55, %c0_56, %c0_57] : memref<3x4x1xf32, #tpu.memory_space<vmem>>, vector<1x4x1xf32>
    %81 = vector.shape_cast %80 : vector<1x4x1xf32> to vector<4x1xf32>
    %82 = vector.broadcast %81 : vector<4x1xf32> to vector<4x256xf32>
    %83 = arith.addf %79, %82 : vector<4x256xf32>
    %84 = arith.addf %43, %83 : vector<4x256xf32>
    %c2 = arith.constant 2 : index
    %85 = memref.load %arg7[%c2] : memref<3xf32, #tpu.memory_space<smem>>
    %c17_i32_58 = arith.constant 17 : i32
    %86 = tpu.dynamic_rotate %84 by %c17_i32_58 dim 1 : vector<4x256xf32>, i32 -> vector<4x256xf32>
    %c16_i32_59 = arith.constant 16 : i32
    %87 = tpu.dynamic_rotate %84 by %c16_i32_59 dim 1 : vector<4x256xf32>, i32 -> vector<4x256xf32>
    %c15_i32_60 = arith.constant 15 : i32
    %88 = tpu.dynamic_rotate %84 by %c15_i32_60 dim 1 : vector<4x256xf32>, i32 -> vector<4x256xf32>
    %c1_i32_61 = arith.constant 1 : i32
    %89 = tpu.dynamic_rotate %84 by %c1_i32_61 dim 1 : vector<4x256xf32>, i32 -> vector<4x256xf32>
    %c255_i32_62 = arith.constant 255 : i32
    %90 = tpu.dynamic_rotate %84 by %c255_i32_62 dim 1 : vector<4x256xf32>, i32 -> vector<4x256xf32>
    %c241_i32_63 = arith.constant 241 : i32
    %91 = tpu.dynamic_rotate %84 by %c241_i32_63 dim 1 : vector<4x256xf32>, i32 -> vector<4x256xf32>
    %c240_i32_64 = arith.constant 240 : i32
    %92 = tpu.dynamic_rotate %84 by %c240_i32_64 dim 1 : vector<4x256xf32>, i32 -> vector<4x256xf32>
    %c239_i32_65 = arith.constant 239 : i32
    %93 = tpu.dynamic_rotate %84 by %c239_i32_65 dim 1 : vector<4x256xf32>, i32 -> vector<4x256xf32>
    %94 = tpu.concatenate %86, %87, %88, %89, %84, %90, %91, %92, %93 in 0 : vector<4x256xf32>, vector<4x256xf32>, vector<4x256xf32>, vector<4x256xf32>, vector<4x256xf32>, vector<4x256xf32>, vector<4x256xf32>, vector<4x256xf32>, vector<4x256xf32> -> vector<36x256xf32>
    %95 = arith.mulf %94, %2 : vector<36x256xf32>
    %c2_66 = arith.constant 2 : index
    %c0_67 = arith.constant 0 : index
    %c0_68 = arith.constant 0 : index
    %96 = vector.load %arg2[%c2_66, %c0_67, %c0_68] : memref<3x4x36xf32, #tpu.memory_space<vmem>>, vector<1x4x36xf32>
    %97 = vector.shape_cast %96 : vector<1x4x36xf32> to vector<4x36xf32>
    %cst_69 = arith.constant dense<0.000000e+00> : vector<4x256xf32>
    %98 = tpu.matmul %97, %95, %cst_69 {dimension_numbers = #tpu.dot_dimension_numbers<[1], [0], [0], [1], [0, 0, 1, 1], [], []>} : vector<4x36xf32>, vector<36x256xf32>, vector<4x256xf32> -> vector<4x256xf32>
    %c2_70 = arith.constant 2 : index
    %c0_71 = arith.constant 0 : index
    %c0_72 = arith.constant 0 : index
    %99 = vector.load %arg3[%c2_70, %c0_71, %c0_72] : memref<3x4x1xf32, #tpu.memory_space<vmem>>, vector<1x4x1xf32>
    %100 = vector.shape_cast %99 : vector<1x4x1xf32> to vector<4x1xf32>
    %101 = vector.broadcast %100 : vector<4x1xf32> to vector<4x256xf32>
    %102 = arith.addf %98, %101 : vector<4x256xf32>
    %cst_73 = arith.constant 0.000000e+00 : f32
    %103 = vector.broadcast %cst_73 : f32 to vector<4x256xf32>
    %104 = arith.cmpf ogt, %102, %103 : vector<4x256xf32>
    %105 = vector.broadcast %85 : f32 to vector<4x256xf32>
    %106 = arith.mulf %102, %105 : vector<4x256xf32>
    %107 = arith.select %104, %102, %106 : vector<4x256xi1>, vector<4x256xf32>
    %c17_i32_74 = arith.constant 17 : i32
    %108 = tpu.dynamic_rotate %107 by %c17_i32_74 dim 1 : vector<4x256xf32>, i32 -> vector<4x256xf32>
    %c16_i32_75 = arith.constant 16 : i32
    %109 = tpu.dynamic_rotate %107 by %c16_i32_75 dim 1 : vector<4x256xf32>, i32 -> vector<4x256xf32>
    %c15_i32_76 = arith.constant 15 : i32
    %110 = tpu.dynamic_rotate %107 by %c15_i32_76 dim 1 : vector<4x256xf32>, i32 -> vector<4x256xf32>
    %c1_i32_77 = arith.constant 1 : i32
    %111 = tpu.dynamic_rotate %107 by %c1_i32_77 dim 1 : vector<4x256xf32>, i32 -> vector<4x256xf32>
    %c255_i32_78 = arith.constant 255 : i32
    %112 = tpu.dynamic_rotate %107 by %c255_i32_78 dim 1 : vector<4x256xf32>, i32 -> vector<4x256xf32>
    %c241_i32_79 = arith.constant 241 : i32
    %113 = tpu.dynamic_rotate %107 by %c241_i32_79 dim 1 : vector<4x256xf32>, i32 -> vector<4x256xf32>
    %c240_i32_80 = arith.constant 240 : i32
    %114 = tpu.dynamic_rotate %107 by %c240_i32_80 dim 1 : vector<4x256xf32>, i32 -> vector<4x256xf32>
    %c239_i32_81 = arith.constant 239 : i32
    %115 = tpu.dynamic_rotate %107 by %c239_i32_81 dim 1 : vector<4x256xf32>, i32 -> vector<4x256xf32>
    %116 = tpu.concatenate %108, %109, %110, %111, %107, %112, %113, %114, %115 in 0 : vector<4x256xf32>, vector<4x256xf32>, vector<4x256xf32>, vector<4x256xf32>, vector<4x256xf32>, vector<4x256xf32>, vector<4x256xf32>, vector<4x256xf32>, vector<4x256xf32> -> vector<36x256xf32>
    %117 = arith.mulf %116, %2 : vector<36x256xf32>
    %c2_82 = arith.constant 2 : index
    %c0_83 = arith.constant 0 : index
    %c0_84 = arith.constant 0 : index
    %118 = vector.load %arg4[%c2_82, %c0_83, %c0_84] : memref<3x4x36xf32, #tpu.memory_space<vmem>>, vector<1x4x36xf32>
    %119 = vector.shape_cast %118 : vector<1x4x36xf32> to vector<4x36xf32>
    %cst_85 = arith.constant dense<0.000000e+00> : vector<4x256xf32>
    %120 = tpu.matmul %119, %117, %cst_85 {dimension_numbers = #tpu.dot_dimension_numbers<[1], [0], [0], [1], [0, 0, 1, 1], [], []>} : vector<4x36xf32>, vector<36x256xf32>, vector<4x256xf32> -> vector<4x256xf32>
    %c2_86 = arith.constant 2 : index
    %c0_87 = arith.constant 0 : index
    %c0_88 = arith.constant 0 : index
    %121 = vector.load %arg5[%c2_86, %c0_87, %c0_88] : memref<3x4x1xf32, #tpu.memory_space<vmem>>, vector<1x4x1xf32>
    %122 = vector.shape_cast %121 : vector<1x4x1xf32> to vector<4x1xf32>
    %123 = vector.broadcast %122 : vector<4x1xf32> to vector<4x256xf32>
    %124 = arith.addf %120, %123 : vector<4x256xf32>
    %125 = arith.addf %84, %124 : vector<4x256xf32>
    %126 = arith.addf %1, %125 : vector<4x256xf32>
    %c0_89 = arith.constant 0 : index
    %c0_90 = arith.constant 0 : index
    %c0_91 = arith.constant 0 : index
    %127 = vector.load %arg8[%c0_89, %c0_90, %c0_91] : memref<1x4x256xf32, #tpu.memory_space<vmem>>, vector<1x4x256xf32>
    %128 = vector.shape_cast %127 : vector<1x4x256xf32> to vector<4x256xf32>
    %129 = vector.shape_cast %126 : vector<4x256xf32> to vector<1x4x256xf32>
    tpu.vector_store %arg8[%c0_89, %c0_90, %c0_91], %129 {strides = array<i32>} : memref<1x4x256xf32, #tpu.memory_space<vmem>>, vector<1x4x256xf32>,
    return
  }
  func.func @transform_0(%arg0: i32) -> (i32, i32, i32) {
    %c0_i32 = arith.constant 0 : i32
    %c0_i32_0 = arith.constant 0 : i32
    %c0_i32_1 = arith.constant 0 : i32
    return %arg0, %c0_i32, %c0_i32_0 : i32, i32, i32
  }
  func.func @transform_1(%arg0: i32) -> (i32, i32, i32) {
    %c0_i32 = arith.constant 0 : i32
    %c0_i32_0 = arith.constant 0 : i32
    %c0_i32_1 = arith.constant 0 : i32
    %c0_i32_2 = arith.constant 0 : i32
    return %c0_i32, %c0_i32_0, %c0_i32_1 : i32, i32, i32
  }
  func.func @transform_2(%arg0: i32) -> (i32, i32, i32) {
    %c0_i32 = arith.constant 0 : i32
    %c0_i32_0 = arith.constant 0 : i32
    %c0_i32_1 = arith.constant 0 : i32
    %c0_i32_2 = arith.constant 0 : i32
    return %c0_i32, %c0_i32_0, %c0_i32_1 : i32, i32, i32
  }
  func.func @transform_3(%arg0: i32) -> (i32, i32, i32) {
    %c0_i32 = arith.constant 0 : i32
    %c0_i32_0 = arith.constant 0 : i32
    %c0_i32_1 = arith.constant 0 : i32
    %c0_i32_2 = arith.constant 0 : i32
    return %c0_i32, %c0_i32_0, %c0_i32_1 : i32, i32, i32
  }
  func.func @transform_4(%arg0: i32) -> (i32, i32, i32) {
    %c0_i32 = arith.constant 0 : i32
    %c0_i32_0 = arith.constant 0 : i32
    %c0_i32_1 = arith.constant 0 : i32
    %c0_i32_2 = arith.constant 0 : i32
    return %c0_i32, %c0_i32_0, %c0_i32_1 : i32, i32, i32
  }
  func.func @transform_5(%arg0: i32) -> (i32, i32) {
    %c0_i32 = arith.constant 0 : i32
    %c0_i32_0 = arith.constant 0 : i32
    %c0_i32_1 = arith.constant 0 : i32
    return %c0_i32, %c0_i32_0 : i32, i32
  }
  func.func @transform_6(%arg0: i32) -> i32 {
    %c0_i32 = arith.constant 0 : i32
    %c0_i32_0 = arith.constant 0 : i32
    return %c0_i32 : i32
  }
  func.func @transform_7(%arg0: i32) -> (i32, i32, i32) {
    %c0_i32 = arith.constant 0 : i32
    %c0_i32_0 = arith.constant 0 : i32
    %c0_i32_1 = arith.constant 0 : i32
    return %arg0, %c0_i32, %c0_i32_0 : i32, i32, i32
  }
}

</mosaic_0001>

<bundles_post_ra>
// kernel: _lambda_.1
= control target key start
LH: loop header
LB: loop body
LE: loop exit
PB: predicated region body
PF: predicated region fallthrough
CT: control target
= control target key end

     0   :  { %12 = vsyncpa [#allocation3], 0  ;;  %s1712_s24 = smov 0   ;;  %s2414_s0 = inlined_call_operand.vmem [shape: f32[2,4,256], index: 0, kind: input, shape index: {}]   ;;  %s2415_s1 = inlined_call_operand.vmem [shape: f32[3,4,36], index: 1, kind: input, shape index: {}]   ;;  %s2416_s2 = inlined_call_operand.vmem [shape: f32[3,4,1], index: 2, kind: input, shape index: {}]   ;;  %s2417_s3 = inlined_call_operand.vmem [shape: f32[3,4,36], index: 3, kind: input, shape index: {}]   ;;  %s2418_s4 = inlined_call_operand.vmem [shape: f32[3,4,1], index: 4, kind: input, shape index: {}]   ;;  %s2419_s5 = inlined_call_operand.vmem [shape: f32[36,256], index: 5, kind: input, shape index: {}]   ;;  %s2420_s6 = inlined_call_operand.vmem [shape: f32[3], index: 6, kind: input, shape index: {}]   ;;  %s2421_s7 = inlined_call_operand.vmem [shape: f32[2,4,256], index: 7, kind: output, shape index: {}]  }
   0x1 LB: > { %s1503_s25 = sadd.s32 4294967295, %s1659_s24   ;;  %p1505_p0 = scmp.ge.s32.totalorder %s1659_s24, 1  ;;  %s1659_s24 = sphi %s1712_s24, %s18_s24  }
   0x2   : > { %p201_p1 = scmp.lt.s32.totalorder %s1659_s24, 3  ;;  %s229_s28 = sshll.u32 %s2420_s6, 4  ;;  %s230_s28 = int_to_ptr.vmem [resolvable:$true] %s229_s28 }
   0x3   : > { %p1602_p3 = scmp.eq.s32.totalorder %s1503_s25, 0  ;;  %s1634_s30 = scalar_lea.vmem %s230_s28, 16 }
   0x4   : > { %p1723_p2 = pnand %p1505_p0, %p201_p1  ;;  %p1635_p6 = scmp.ne.s32.totalorder %s230_s28, %s1634_s30 }
   0x5   : > { %p1642_p10 = scmp.lt.s32.totalorder %s230_s28, %s230_s28  ;;  %p1643_p11 = scmp.lt.s32.totalorder %s1634_s30, %s1634_s30 }
   0x6   : > { %p1598_p4 = pneg %p1723_p2 }
   0x7   : > { %p1644_p12 = por %p1643_p11, %p1642_p10 }
   0x8   : > { %p1599_p5 = pnand %p1602_p3, %p1598_p4 }
   0xa   : > { %p1636_p7 = pneg %p1599_p5 }
   0xc   : > { %p1637_p8 = pnand %p1636_p7, %p1635_p6 }
   0xe   : > { %p1638_p9 = pneg %p1637_p8 }
  0x10   : > { %p1645_p13 = pnand %p1644_p12, %p1638_p9 }
  0x12   : > { %1648 = shalt.err (!%p1645_p13)
}
  0x13   : > { %s1661_s8 = smov [#allocation2]   ;;  %250 = sbr.rel (%p1723_p2) target bundleno = 2262 (0x8d6), region = 48 }
  0x14   : > { %1601 = dma.vmem_to_smem (!%p1599_p5), %s230_s28, 16, %s1661_s8, [#allocation3]  }
  0x1a   : > { %1654 = dma.done.wait (%p1602_p3), [#allocation3], 16  }
  0x1b   : > { %1656 = vsyncadd (%p1602_p3), [#allocation3], 4294967280 }
  0x1c   : > { %256 = sfence }
  0x1d   : > { %p283_p0 = scmp.lt.s32.totalorder %s1503_s25, 1  ;;  %s1662_s13 = smov 1   ;;  %v1668_v2 = vmov 0.0   ;;  %v1670_v3 = vmov 0   ;;  %v410_v4 = vld [vmem:[%s2416_s2] sm:$0xf]  ;;  %v312_v5 = vlaneseq }
  0x1e   : > { %s1663_s14 = smov 16   ;;  %s1664_s15 = smov 17   ;;  %490 = vmatprep.mubr.f32.mxu0 %v1668_v2  ;;  %674 = vmatprep.mubr.f32.mxu1 %v1668_v2  ;;  %vm390_vm3 = vcmask 1043456   ;;  %v1809_v21 = vld [vmem:[%s2419_s5 + $0x8] sm:$0xff]  ;;  %v1814_v26 = vld [vmem:[%s2419_s5 + $0x18] sm:$0xff]  ;;  %v1820_v28 = vld [vmem:[%s2419_s5] sm:$0xff] }
  0x1f   : > { %s2424_s25 = smov (!%p283_p0, %s1503_s25), 1  ;;  %s1665_s16 = smov 15   ;;  %1623 = vset.pattern.permute.xlu0 %v1670_v3  ;;  %1624 = vset.pattern.permute.xlu1 %v1670_v3  ;;  %v1788_v8 = vand.u32 127, %v312_v5  ;;  %v1825_v29 = vld [vmem:[%s2419_s5 + $0x10] sm:$0xff]  ;;  %v1852_v51 = vld [vmem:[%s2419_s5 + $0x28] sm:$0xff]  ;;  %v1866_v58 = vld [vmem:[%s2419_s5 + $0x38] sm:$0xff] }
  0x20   : > { %s1544_s9 = sshll.u32 %s2424_s25, 3  ;;  %s1666_s17 = smov 127   ;;  %v1861_v57 = vld [vmem:[%s2419_s5 + $0x30] sm:$0xff]  ;;  %v1871_v60 = vld [vmem:[%s2419_s5 + $0x20] sm:$0xff]  ;;  %vm416_vm9 = vcmask 293888  }
  0x21   : > { %s1742_s12 = scalar_lea.vmem %s2414_s0, %s1544_s9  ;;  %s1667_s18 = smov 112   ;;  %vm335_vm0 = vcmp.lt.s32.totalorder %v1788_v8, 1  ;;  %vm321_vm1 = vcmp.lt.s32.totalorder %v1788_v8, 16  ;;  %vm314_vm2 = vcmp.lt.s32.totalorder %v1788_v8, 17  ;;  %vm328_vm4 = vcmp.lt.s32.totalorder %v1788_v8, 15 }
  0x22   : > { %v1745_v0 = vld [vmem:[%s1742_s12] sm:$0xff]  ;;  %s1669_s19 = smov 113   ;;  %s1671_s20 = smov 111   ;;  %vm342_vm5 = vcmp.lt.s32.totalorder %v1788_v8, 127  ;;  %vm356_vm6 = vcmp.lt.s32.totalorder %v1788_v8, 112  ;;  %vm349_vm7 = vcmp.lt.s32.totalorder %v1788_v8, 113 }
  0x23   : > { %331 = vrot.lane.b32.xlu1 %v1745_v0, %s1662_s13  ;;  %317 = vrot.lane.b32.xlu0 %v1745_v0, %s1663_s14  ;;  %v1753_v1 = vcombine.high %v1745_v0, %v1745_v0  ;;  %vm363_vm8 = vcmp.lt.s32.totalorder %v1788_v8, 111  ;;  %s304_s23 = sld [smem:[#allocation2]]  ;;  %s1520_s21 = sld [smem:[#allocation2 + $0x1]] }
  0x24   : > { %s1531_s10 = sld [smem:[#allocation2 + $0x2]] }
  0x27   : > { %308 = vrot.lane.b32.xlu0 %v1745_v0, %s1664_s15  ;;  %333 = vrot.lane.b32.xlu1 %v1753_v1, %s1662_s13 }
  0x2b   : > { %310 = vrot.lane.b32.xlu1 %v1753_v1, %s1664_s15  ;;  %319 = vrot.lane.b32.xlu0 %v1753_v1, %s1663_s14 }
  0x2f   : > { %326 = vrot.lane.b32.xlu1 %v1753_v1, %s1665_s16  ;;  %324 = vrot.lane.b32.xlu0 %v1745_v0, %s1665_s16 }
  0x33   : > { %340 = vrot.lane.b32.xlu1 %v1753_v1, %s1666_s17  ;;  %338 = vrot.lane.b32.xlu0 %v1745_v0, %s1666_s17 }
  0x37   : > { %354 = vrot.lane.b32.xlu1 %v1753_v1, %s1667_s18  ;;  %352 = vrot.lane.b32.xlu0 %v1745_v0, %s1667_s18 }
  0x3b   : > { %347 = vrot.lane.b32.xlu1 %v1753_v1, %s1669_s19  ;;  %345 = vrot.lane.b32.xlu0 %v1745_v0, %s1669_s19 }
  0x3f   : > { %361 = vrot.lane.b32.xlu1 %v1753_v1, %s1671_s20  ;;  %359 = vrot.lane.b32.xlu0 %v1745_v0, %s1671_s20 }
  0x43   : > { %413 = vperm.xlu0 %1623, %v410_v4  }
  0x95   : > { %v332_v6 = vpop.permute.xlu1 %331  ;;  %v318_v7 = vpop.permute.xlu0 %317 }
  0x99   : > { %v309_v9 = vpop.permute.xlu0 %308  ;;  %v334_v10 = vpop.permute.xlu1 %333 }
  0x9a   : > { %v336_v13 = vsel %vm335_vm0, %v332_v6, %v334_v10  ;;  %v337_v14 = vsel %vm335_vm0, %v334_v10, %v332_v6  ;;  %v1886_v6 = vld [vmem:[%s2419_s5 + $0x48] sm:$0xf] }
  0x9b   : > { %v374_v22 = vrot.slane %v337_v14, 4  ;;  %v375_v23 = vrot.slane %v336_v13, 4 }
  0x9d   : > { %v311_v11 = vpop.permute.xlu1 %310  ;;  %v320_v12 = vpop.permute.xlu0 %319 }
  0x9e   : > { %v322_v15 = vsel %vm321_vm1, %v318_v7, %v320_v12  ;;  %v323_v16 = vsel %vm321_vm1, %v320_v12, %v318_v7  ;;  %v315_v19 = vsel %vm314_vm2, %v309_v9, %v311_v11  ;;  %v316_v20 = vsel %vm314_vm2, %v311_v11, %v309_v9  ;;  %v1892_v12 = vld [vmem:[%s2419_s5 + $0x40] sm:$0xf] }
  0x9f   : > { %v368_v17 = vrot.slane %v323_v16, 4  ;;  %v369_v18 = vrot.slane %v322_v15, 4 }
  0xa1   : > { %v327_v24 = vpop.permute.xlu1 %326  ;;  %v325_v25 = vpop.permute.xlu0 %324  ;;  %v392_v27 = vsel %vm390_vm3, %v315_v19, %v369_v18  ;;  %v391_v30 = vsel %vm390_vm3, %v316_v20, %v368_v17  ;;  %v409_v18 = vld [vmem:[%s2415_s1] sm:$0xf] }
  0xa2   : > { %v329_v31 = vsel %vm328_vm4, %v325_v25, %v327_v24  ;;  %v330_v32 = vsel %vm328_vm4, %v327_v24, %v325_v25  ;;  %v400_v35 = vmul.f32 %v392_v27, %v1809_v21  ;;  %v399_v37 = vmul.f32 %v391_v30, %v1820_v28 }
  0xa3   : > { %v393_v33 = vsel %vm390_vm3, %v330_v32, %v374_v22  ;;  %v394_v34 = vsel %vm390_vm3, %v329_v31, %v375_v23  ;;  %v499_v22 = vstv %s304_s23 }
  0xa4   : > { %v402_v36 = vmul.f32 %v394_v34, %v1814_v26  ;;  %v401_v38 = vmul.f32 %v393_v33, %v1825_v29  ;;  %v595_v33 = vld [vmem:[%s2418_s4] sm:$0xf] }
  0xa5   : > { %v341_v39 = vpop.permute.xlu1 %340  ;;  %v339_v40 = vpop.permute.xlu0 %338 }
  0xa6   : > { %v343_v41 = vsel %vm342_vm5, %v339_v40, %v341_v39  ;;  %v344_v42 = vsel %vm342_vm5, %v341_v39, %v339_v40  ;;  %v1546_v43 = vpack.c.bf16 %v402_v36, %v400_v35  ;;  %v1548_v44 = vpack.c.bf16 %v401_v38, %v399_v37 }
  0xa7   : > { %v380_v45 = vrot.slane %v343_v41, 4  ;;  %v381_v46 = vrot.slane %v344_v42, 4 }
  0xa8   : > { %1547 = vmatprep.subr.bf16.mxu0 %v1546_v43 }
  0xa9   : > { %v355_v47 = vpop.permute.xlu1 %354  ;;  %1549 = vmatpush1.bf16.msra.mxu0 %v1548_v44  ;;  %v353_v48 = vpop.permute.xlu0 %352  ;;  %v395_v52 = vsel %vm390_vm3, %v1745_v0, %v380_v45  ;;  %v396_v53 = vsel %vm390_vm3, %v1753_v1, %v381_v46 }
  0xaa   : > { %v357_v49 = vsel %vm356_vm6, %v353_v48, %v355_v47  ;;  %v358_v50 = vsel %vm356_vm6, %v355_v47, %v353_v48  ;;  %v404_v5 = vmul.f32 %v396_v53, %v1852_v51  ;;  %v403_v7 = vmul.f32 %v395_v52, %v1871_v60 }
  0xab   : > { %v386_v54 = vrot.slane %v357_v49, 4  ;;  %v387_v55 = vrot.slane %v358_v50, 4 }
  0xad   : > { %v348_v56 = vpop.permute.xlu1 %347  ;;  %v346_v59 = vpop.permute.xlu0 %345 }
  0xae   : > { %v350_v61 = vsel %vm349_vm7, %v346_v59, %v348_v56  ;;  %v351_v62 = vsel %vm349_vm7, %v348_v56, %v346_v59 }
  0xaf   : > { %v397_v63 = vsel %vm390_vm3, %v350_v61, %v386_v54  ;;  %v398_v1 = vsel %vm390_vm3, %v351_v62, %v387_v55 }
  0xb0   : > { %v405_v3 = vmul.f32 %v397_v63, %v1861_v57  ;;  %v406_v4 = vmul.f32 %v398_v1, %v1866_v58 }
  0xb1   : > { %v362_v9 = vpop.permute.xlu1 %361  ;;  %v360_v10 = vpop.permute.xlu0 %359 }
  0xb2   : > { %v1550_v11 = vpack.c.bf16 %v406_v4, %v404_v5  ;;  %v364_v13 = vsel %vm363_vm8, %v360_v10, %v362_v9  ;;  %v365_v14 = vsel %vm363_vm8, %v362_v9, %v360_v10  ;;  %v1552_v15 = vpack.c.bf16 %v405_v3, %v403_v7 }
  0xb3   : > { %v408_v16 = vmul.f32 %v365_v14, %v1886_v6  ;;  %v407_v17 = vmul.f32 %v364_v13, %v1892_v12 }
  0xb4   : > { %1551 = vmatprep.subr.bf16.mxu0 %v1550_v11 }
  0xb5   : > { %1553 = vmatpush1.bf16.msra.mxu0 %v1552_v15 }
  0xb6   : > { %1514 = vmatprep.subr.msk.mxu0 %vm390_vm3, %v408_v16 }
  0xb9   : > { %1515 = vmatpush1.msk.msra.mxu0 %vm390_vm3, %v407_v17 }
  0xba   : > { %1516 = vmatmul.mubr.msk.f32.vlgmr.msra.gmra.mrb[0].mxu0 %vm416_vm9, %v409_v18 }
  0xbb   : > { %862 = vmatprep.mubr.f32.mxu0 %v1668_v2 }
  0xc2   : > { %v414_v19 = vpop.permute.xlu0 %413 }
 0x18d   : > { %v492_v20 = vpop.f32.mrb[0].mxu0 }
 0x18e   : > { %v493_v23 = vadd.f32 %v492_v20, %v414_v19  ;;  %v494_v24 = vpop.f32.mrb[1].mxu0 }
 0x18f   : > { %v495_v25 = vadd.f32 %v494_v24, %v414_v19 }
 0x190   : > { %vm497_vm10 = vcmp.gt.f32.partialorder %v493_v23, 0.0  ;;  %v500_v27 = vmul.f32 %v499_v22, %v493_v23 }
 0x191   : > { %v501_v30 = vmul.f32 %v499_v22, %v495_v25  ;;  %vm498_vm11 = vcmp.gt.f32.partialorder %v495_v25, 0.0 }
 0x192   : > { %v1907_v31 = vsel %vm497_vm10, %v493_v23, %v500_v27 }
 0x193   : > { %522 = vrot.lane.b32.xlu0 %v1907_v31, %s1662_s13  ;;  %510 = vrot.lane.b32.xlu1 %v1907_v31, %s1663_s14  ;;  %v503_v32 = vsel %vm498_vm11, %v495_v25, %v501_v30 }
 0x197   : > { %504 = vrot.lane.b32.xlu0 %v1907_v31, %s1664_s15  ;;  %512 = vrot.lane.b32.xlu1 %v503_v32, %s1663_s14 }
 0x19b   : > { %516 = vrot.lane.b32.xlu0 %v1907_v31, %s1665_s16  ;;  %524 = vrot.lane.b32.xlu1 %v503_v32, %s1662_s13 }
 0x19f   : > { %528 = vrot.lane.b32.xlu0 %v1907_v31, %s1666_s17  ;;  %506 = vrot.lane.b32.xlu1 %v503_v32, %s1664_s15 }
 0x1a3   : > { %540 = vrot.lane.b32.xlu0 %v1907_v31, %s1667_s18  ;;  %518 = vrot.lane.b32.xlu1 %v503_v32, %s1665_s16 }
 0x1a7   : > { %534 = vrot.lane.b32.xlu0 %v1907_v31, %s1669_s19  ;;  %530 = vrot.lane.b32.xlu1 %v503_v32, %s1666_s17 }
 0x1ab   : > { %546 = vrot.lane.b32.xlu0 %v1907_v31, %s1671_s20  ;;  %542 = vrot.lane.b32.xlu1 %v503_v32, %s1667_s18 }
 0x1af   : > { %598 = vperm.xlu0 %1623, %v595_v33   ;;  %536 = vrot.lane.b32.xlu1 %v503_v32, %s1669_s19 }
 0x1b3   : > { %548 = vrot.lane.b32.xlu1 %v503_v32, %s1671_s20 }
 0x205   : > { %v523_v34 = vpop.permute.xlu0 %522  ;;  %v511_v35 = vpop.permute.xlu1 %510 }
 0x209   : > { %v505_v36 = vpop.permute.xlu0 %504  ;;  %v513_v37 = vpop.permute.xlu1 %512 }
 0x20a   : > { %v514_v40 = vsel %vm321_vm1, %v511_v35, %v513_v37  ;;  %v515_v41 = vsel %vm321_vm1, %v513_v37, %v511_v35 }
 0x20b   : > { %v554_v47 = vrot.slane %v515_v41, 4  ;;  %v555_v48 = vrot.slane %v514_v40, 4 }
 0x20d   : > { %v517_v38 = vpop.permute.xlu0 %516  ;;  %v525_v39 = vpop.permute.xlu1 %524 }
 0x20e   : > { %v526_v43 = vsel %vm335_vm0, %v523_v34, %v525_v39  ;;  %v527_v44 = vsel %vm335_vm0, %v525_v39, %v523_v34 }
 0x20f   : > { %v560_v50 = vrot.slane %v527_v44, 4  ;;  %v561_v52 = vrot.slane %v526_v43, 4 }
 0x211   : > { %v507_v42 = vpop.permute.xlu1 %506  ;;  %v529_v49 = vpop.permute.xlu0 %528 }
 0x212   : > { %v508_v45 = vsel %vm314_vm2, %v505_v36, %v507_v42  ;;  %v509_v46 = vsel %vm314_vm2, %v507_v42, %v505_v36 }
 0x213   : > { %v576_v53 = vsel %vm390_vm3, %v509_v46, %v554_v47  ;;  %v577_v55 = vsel %vm390_vm3, %v508_v45, %v555_v48  ;;  %v594_v45 = vld [vmem:[%s2417_s3] sm:$0xf] }
 0x214   : > { %v585_v63 = vmul.f32 %v577_v55, %v1809_v21  ;;  %v584_v3 = vmul.f32 %v576_v53, %v1820_v28 }
 0x215   : > { %v519_v54 = vpop.permute.xlu1 %518  ;;  %v541_v5 = vpop.permute.xlu0 %540 }
 0x216   : > { %v520_v56 = vsel %vm328_vm4, %v517_v38, %v519_v54  ;;  %v521_v59 = vsel %vm328_vm4, %v519_v54, %v517_v38 }
 0x217   : > { %v578_v61 = vsel %vm390_vm3, %v521_v59, %v560_v50  ;;  %v579_v62 = vsel %vm390_vm3, %v520_v56, %v561_v52 }
 0x218   : > { %v587_v1 = vmul.f32 %v579_v62, %v1814_v26  ;;  %v586_v4 = vmul.f32 %v578_v61, %v1825_v29 }
 0x219   : > { %v531_v7 = vpop.permute.xlu1 %530  ;;  %v535_v19 = vpop.permute.xlu0 %534 }
 0x21a   : > { %v532_v9 = vsel %vm342_vm5, %v529_v49, %v531_v7  ;;  %v533_v10 = vsel %vm342_vm5, %v531_v7, %v529_v49  ;;  %v1554_v11 = vpack.c.bf16 %v587_v1, %v585_v63  ;;  %v1556_v13 = vpack.c.bf16 %v586_v4, %v584_v3 }
 0x21b   : > { %v566_v14 = vrot.slane %v532_v9, 4  ;;  %v567_v15 = vrot.slane %v533_v10, 4 }
 0x21c   : > { %1555 = vmatprep.subr.bf16.mxu1 %v1554_v11 }
 0x21d   : > { %1557 = vmatpush1.bf16.msra.mxu1 %v1556_v13  ;;  %v543_v16 = vpop.permute.xlu1 %542  ;;  %v580_v20 = vsel %vm390_vm3, %v1907_v31, %v566_v14  ;;  %v581_v22 = vsel %vm390_vm3, %v503_v32, %v567_v15  ;;  %v547_v37 = vpop.permute.xlu0 %546 }
 0x21e   : > { %v544_v17 = vsel %vm356_vm6, %v541_v5, %v543_v16  ;;  %v545_v18 = vsel %vm356_vm6, %v543_v16, %v541_v5  ;;  %v589_v31 = vmul.f32 %v581_v22, %v1852_v51  ;;  %v588_v32 = vmul.f32 %v580_v20, %v1871_v60 }
 0x21f   : > { %v572_v23 = vrot.slane %v544_v17, 4  ;;  %v573_v24 = vrot.slane %v545_v18, 4 }
 0x221   : > { %v537_v25 = vpop.permute.xlu1 %536 }
 0x222   : > { %v538_v27 = vsel %vm349_vm7, %v535_v19, %v537_v25  ;;  %v539_v30 = vsel %vm349_vm7, %v537_v25, %v535_v19 }
 0x223   : > { %v582_v33 = vsel %vm390_vm3, %v538_v27, %v572_v23  ;;  %v583_v34 = vsel %vm390_vm3, %v539_v30, %v573_v24 }
 0x224   : > { %v590_v35 = vmul.f32 %v582_v33, %v1861_v57  ;;  %v591_v36 = vmul.f32 %v583_v34, %v1866_v58 }
 0x225   : > { %v549_v38 = vpop.permute.xlu1 %548 }
 0x226   : > { %v551_v39 = vsel %vm363_vm8, %v549_v38, %v547_v37  ;;  %v1558_v40 = vpack.c.bf16 %v591_v36, %v589_v31  ;;  %v1560_v41 = vpack.c.bf16 %v590_v35, %v588_v32  ;;  %v550_v43 = vsel %vm363_vm8, %v547_v37, %v549_v38 }
 0x227   : > { %v593_v42 = vmul.f32 %v551_v39, %v1886_v6  ;;  %v592_v44 = vmul.f32 %v550_v43, %v1892_v12 }
 0x228   : > { %1559 = vmatprep.subr.bf16.mxu1 %v1558_v40 }
 0x229   : > { %1561 = vmatpush1.bf16.msra.mxu1 %v1560_v41 }
 0x22a   : > { %1517 = vmatprep.subr.msk.mxu1 %vm390_vm3, %v593_v42 }
 0x22d   : > { %1518 = vmatpush1.msk.msra.mxu1 %vm390_vm3, %v592_v44 }
 0x22e   : > { %1519 = vmatmul.mubr.msk.f32.vlgmr.msra.gmra.mrb[0].mxu1 %vm416_vm9, %v594_v45  ;;  %v599_v46 = vpop.permute.xlu0 %598 }
 0x22f   : > { %1048 = vmatprep.mubr.f32.mxu1 %v1668_v2 }
 0x301   : > { %v676_v47 = vpop.f32.mrb[0].mxu1 }
 0x302   : > { %v677_v48 = vadd.f32 %v676_v47, %v599_v46  ;;  %v678_v49 = vpop.f32.mrb[1].mxu1 }
 0x303   : > { %v679_v50 = vadd.f32 %v678_v49, %v599_v46 }
 0x305   : > { %v683_v52 = vcombine.low %v677_v48, %v679_v50 }
 0x307   : > { %v1995_v53 = vadd.f32 %v683_v52, %v1745_v0  ;;  %v1522_v0 = vld [vmem:[%s2416_s2 + $0x4] sm:$0xf] }
 0x309   : > { %696 = vrot.lane.b32.xlu1 %v1995_v53, %s1663_s14  ;;  %v2001_v54 = vcombine.high %v1995_v53, %v1995_v53 }
 0x30b   : > { %698 = vrot.lane.b32.xlu0 %v2001_v54, %s1663_s14 }
 0x30d   : > { %708 = vrot.lane.b32.xlu1 %v1995_v53, %s1662_s13 }
 0x30f   : > { %710 = vrot.lane.b32.xlu0 %v2001_v54, %s1662_s13 }
 0x311   : > { %690 = vrot.lane.b32.xlu1 %v1995_v53, %s1664_s15 }
 0x313   : > { %692 = vrot.lane.b32.xlu0 %v2001_v54, %s1664_s15 }
 0x315   : > { %702 = vrot.lane.b32.xlu1 %v1995_v53, %s1665_s16 }
 0x317   : > { %704 = vrot.lane.b32.xlu0 %v2001_v54, %s1665_s16 }
 0x319   : > { %714 = vrot.lane.b32.xlu1 %v1995_v53, %s1666_s17 }
 0x31b   : > { %716 = vrot.lane.b32.xlu0 %v2001_v54, %s1666_s17 }
 0x31d   : > { %726 = vrot.lane.b32.xlu1 %v1995_v53, %s1667_s18 }
 0x31f   : > { %728 = vrot.lane.b32.xlu0 %v2001_v54, %s1667_s18 }
 0x321   : > { %720 = vrot.lane.b32.xlu1 %v1995_v53, %s1669_s19 }
 0x323   : > { %722 = vrot.lane.b32.xlu0 %v2001_v54, %s1669_s19 }
 0x325   : > { %732 = vrot.lane.b32.xlu1 %v1995_v53, %s1671_s20 }
 0x327   : > { %734 = vrot.lane.b32.xlu0 %v2001_v54, %s1671_s20 }
 0x329   : > { %786 = vperm.xlu1 %1624, %v1522_v0  }
 0x37b   : > { %v697_v55 = vpop.permute.xlu1 %696 }
 0x37d   : > { %v699_v56 = vpop.permute.xlu0 %698 }
 0x37e   : > { %v700_v63 = vsel %vm321_vm1, %v697_v55, %v699_v56  ;;  %v701_v1 = vsel %vm321_vm1, %v699_v56, %v697_v55 }
 0x37f   : > { %v709_v59 = vpop.permute.xlu1 %708  ;;  %v740_v10 = vrot.slane %v701_v1, 4  ;;  %v741_v11 = vrot.slane %v700_v63, 4 }
 0x381   : > { %v711_v61 = vpop.permute.xlu0 %710 }
 0x382   : > { %v712_v4 = vsel %vm335_vm0, %v709_v59, %v711_v61  ;;  %v713_v5 = vsel %vm335_vm0, %v711_v61, %v709_v59 }
 0x383   : > { %v691_v62 = vpop.permute.xlu1 %690  ;;  %v746_v14 = vrot.slane %v713_v5, 4  ;;  %v747_v15 = vrot.slane %v712_v4, 4 }
 0x385   : > { %v693_v3 = vpop.permute.xlu0 %692 }
 0x386   : > { %v694_v7 = vsel %vm314_vm2, %v691_v62, %v693_v3  ;;  %v695_v9 = vsel %vm314_vm2, %v693_v3, %v691_v62 }
 0x387   : > { %v703_v13 = vpop.permute.xlu1 %702  ;;  %v762_v16 = vsel %vm390_vm3, %v695_v9, %v740_v10  ;;  %v763_v17 = vsel %vm390_vm3, %v694_v7, %v741_v11  ;;  %v1521_v9 = vld [vmem:[%s2415_s1 + $0x4] sm:$0xf] }
 0x388   : > { %v770_v25 = vmul.f32 %v762_v16, %v1820_v28  ;;  %v771_v27 = vmul.f32 %v763_v17, %v1809_v21 }
 0x389   : > { %v705_v18 = vpop.permute.xlu0 %704 }
 0x38a   : > { %v706_v19 = vsel %vm328_vm4, %v703_v13, %v705_v18  ;;  %v707_v20 = vsel %vm328_vm4, %v705_v18, %v703_v13  ;;  %v871_v13 = vstv %s1520_s21 }
 0x38b   : > { %v764_v22 = vsel %vm390_vm3, %v707_v20, %v746_v14  ;;  %v765_v23 = vsel %vm390_vm3, %v706_v19, %v747_v15  ;;  %v715_v24 = vpop.permute.xlu1 %714 }
 0x38c   : > { %v772_v30 = vmul.f32 %v764_v22, %v1825_v29  ;;  %v773_v33 = vmul.f32 %v765_v23, %v1814_v26  ;;  %v1527_v22 = vld [vmem:[%s2418_s4 + $0x4] sm:$0xf] }
 0x38d   : > { %v717_v34 = vpop.permute.xlu0 %716 }
 0x38e   : > { %v1564_v35 = vpack.c.bf16 %v772_v30, %v770_v25  ;;  %v718_v36 = vsel %vm342_vm5, %v715_v24, %v717_v34  ;;  %v719_v31 = vsel %vm342_vm5, %v717_v34, %v715_v24  ;;  %v1562_v32 = vpack.c.bf16 %v773_v33, %v771_v27 }
 0x38f   : > { %v727_v37 = vpop.permute.xlu1 %726  ;;  %v752_v38 = vrot.slane %v718_v36, 4  ;;  %v753_v39 = vrot.slane %v719_v31, 4 }
 0x390   : > { %1563 = vmatprep.subr.bf16.mxu0 %v1562_v32 }
 0x391   : > { %1565 = vmatpush1.bf16.msra.mxu0 %v1564_v35  ;;  %v729_v40 = vpop.permute.xlu0 %728  ;;  %v766_v44 = vsel %vm390_vm3, %v1995_v53, %v752_v38  ;;  %v767_v45 = vsel %vm390_vm3, %v2001_v54, %v753_v39 }
 0x392   : > { %v730_v41 = vsel %vm356_vm6, %v727_v37, %v729_v40  ;;  %v731_v42 = vsel %vm356_vm6, %v729_v40, %v727_v37  ;;  %v774_v55 = vmul.f32 %v766_v44, %v1871_v60  ;;  %v775_v54 = vmul.f32 %v767_v45, %v1852_v51 }
 0x393   : > { %v721_v43 = vpop.permute.xlu1 %720  ;;  %v758_v46 = vrot.slane %v730_v41, 4  ;;  %v759_v47 = vrot.slane %v731_v42, 4 }
 0x395   : > { %v723_v48 = vpop.permute.xlu0 %722 }
 0x396   : > { %v724_v49 = vsel %vm349_vm7, %v721_v43, %v723_v48  ;;  %v725_v50 = vsel %vm349_vm7, %v723_v48, %v721_v43 }
 0x397   : > { %v768_v52 = vsel %vm390_vm3, %v724_v49, %v758_v46  ;;  %v769_v0 = vsel %vm390_vm3, %v725_v50, %v759_v47  ;;  %v733_v61 = vpop.permute.xlu1 %732 }
 0x398   : > { %v776_v56 = vmul.f32 %v768_v52, %v1861_v57  ;;  %v777_v59 = vmul.f32 %v769_v0, %v1866_v58 }
 0x399   : > { %v735_v62 = vpop.permute.xlu0 %734 }
 0x39a   : > { %v1568_v63 = vpack.c.bf16 %v776_v56, %v774_v55  ;;  %v737_v1 = vsel %vm363_vm8, %v735_v62, %v733_v61  ;;  %v1566_v3 = vpack.c.bf16 %v777_v59, %v775_v54  ;;  %v736_v5 = vsel %vm363_vm8, %v733_v61, %v735_v62 }
 0x39b   : > { %v779_v4 = vmul.f32 %v737_v1, %v1886_v6  ;;  %v778_v7 = vmul.f32 %v736_v5, %v1892_v12 }
 0x39c   : > { %1567 = vmatprep.subr.bf16.mxu0 %v1566_v3 }
 0x39d   : > { %1569 = vmatpush1.bf16.msra.mxu0 %v1568_v63 }
 0x39e   : > { %1523 = vmatprep.subr.msk.mxu0 %vm390_vm3, %v779_v4 }
 0x3a1   : > { %1524 = vmatpush1.msk.msra.mxu0 %vm390_vm3, %v778_v7 }
 0x3a2   : > { %1525 = vmatmul.mubr.msk.f32.vlgmr.msra.gmra.mrb[2].mxu0 %vm416_vm9, %v1521_v9 }
 0x3a3   : > { %1236 = vmatprep.mubr.f32.mxu0 %v1668_v2 }
 0x3a8   : > { %v787_v10 = vpop.permute.xlu1 %786 }
 0x475   : > { %v864_v11 = vpop.f32.mrb[2].mxu0 }
 0x476   : > { %v865_v14 = vadd.f32 %v864_v11, %v787_v10  ;;  %v866_v15 = vpop.f32.mrb[3].mxu0 }
 0x477   : > { %v867_v16 = vadd.f32 %v866_v15, %v787_v10 }
 0x478   : > { %vm869_vm12 = vcmp.gt.f32.partialorder %v865_v14, 0.0  ;;  %v872_v17 = vmul.f32 %v871_v13, %v865_v14 }
 0x479   : > { %vm870_vm13 = vcmp.gt.f32.partialorder %v867_v16, 0.0  ;;  %v873_v18 = vmul.f32 %v871_v13, %v867_v16 }
 0x47a   : > { %v2095_v19 = vsel %vm869_vm12, %v865_v14, %v872_v17 }
 0x47b   : > { %v2097_v20 = vsel %vm870_vm13, %v867_v16, %v873_v18  ;;  %882 = vrot.lane.b32.xlu0 %v2095_v19, %s1663_s14 }
 0x47c   : > { %884 = vrot.lane.b32.xlu1 %v2097_v20, %s1663_s14 }
 0x47f   : > { %894 = vrot.lane.b32.xlu0 %v2095_v19, %s1662_s13 }
 0x480   : > { %896 = vrot.lane.b32.xlu1 %v2097_v20, %s1662_s13 }
 0x483   : > { %876 = vrot.lane.b32.xlu0 %v2095_v19, %s1664_s15 }
 0x484   : > { %878 = vrot.lane.b32.xlu1 %v2097_v20, %s1664_s15 }
 0x487   : > { %888 = vrot.lane.b32.xlu0 %v2095_v19, %s1665_s16 }
 0x488   : > { %890 = vrot.lane.b32.xlu1 %v2097_v20, %s1665_s16 }
 0x48b   : > { %900 = vrot.lane.b32.xlu0 %v2095_v19, %s1666_s17 }
 0x48c   : > { %902 = vrot.lane.b32.xlu1 %v2097_v20, %s1666_s17 }
 0x48f   : > { %912 = vrot.lane.b32.xlu0 %v2095_v19, %s1667_s18 }
 0x490   : > { %914 = vrot.lane.b32.xlu1 %v2097_v20, %s1667_s18 }
 0x493   : > { %906 = vrot.lane.b32.xlu0 %v2095_v19, %s1669_s19 }
 0x494   : > { %908 = vrot.lane.b32.xlu1 %v2097_v20, %s1669_s19 }
 0x497   : > { %918 = vrot.lane.b32.xlu0 %v2095_v19, %s1671_s20 }
 0x498   : > { %920 = vrot.lane.b32.xlu1 %v2097_v20, %s1671_s20 }
 0x49b   : > { %972 = vperm.xlu0 %1623, %v1527_v22  }
 0x4ed   : > { %v883_v23 = vpop.permute.xlu0 %882 }
 0x4ee   : > { %v885_v24 = vpop.permute.xlu1 %884 }
 0x4ef   : > { %v886_v30 = vsel %vm321_vm1, %v883_v23, %v885_v24  ;;  %v887_v33 = vsel %vm321_vm1, %v885_v24, %v883_v23 }
 0x4f0   : > { %v926_v38 = vrot.slane %v887_v33, 4  ;;  %v927_v39 = vrot.slane %v886_v30, 4 }
 0x4f1   : > { %v895_v25 = vpop.permute.xlu0 %894 }
 0x4f2   : > { %v897_v27 = vpop.permute.xlu1 %896 }
 0x4f3   : > { %v898_v36 = vsel %vm335_vm0, %v895_v25, %v897_v27  ;;  %v899_v31 = vsel %vm335_vm0, %v897_v27, %v895_v25 }
 0x4f4   : > { %v932_v41 = vrot.slane %v899_v31, 4  ;;  %v933_v42 = vrot.slane %v898_v36, 4 }
 0x4f5   : > { %v877_v34 = vpop.permute.xlu0 %876 }
 0x4f6   : > { %v879_v35 = vpop.permute.xlu1 %878 }
 0x4f7   : > { %v880_v32 = vsel %vm314_vm2, %v877_v34, %v879_v35  ;;  %v881_v37 = vsel %vm314_vm2, %v879_v35, %v877_v34 }
 0x4f8   : > { %v948_v43 = vsel %vm390_vm3, %v881_v37, %v926_v38  ;;  %v949_v44 = vsel %vm390_vm3, %v880_v32, %v927_v39  ;;  %v1526_v37 = vld [vmem:[%s2417_s3 + $0x4] sm:$0xf] }
 0x4f9   : > { %v889_v40 = vpop.permute.xlu0 %888  ;;  %v956_v50 = vmul.f32 %v948_v43, %v1820_v28  ;;  %v957_v52 = vmul.f32 %v949_v44, %v1809_v21 }
 0x4fa   : > { %v891_v45 = vpop.permute.xlu1 %890 }
 0x4fb   : > { %v892_v46 = vsel %vm328_vm4, %v889_v40, %v891_v45  ;;  %v893_v47 = vsel %vm328_vm4, %v891_v45, %v889_v40 }
 0x4fc   : > { %v950_v48 = vsel %vm390_vm3, %v893_v47, %v932_v41  ;;  %v951_v49 = vsel %vm390_vm3, %v892_v46, %v933_v42 }
 0x4fd   : > { %v958_v0 = vmul.f32 %v950_v48, %v1825_v29  ;;  %v959_v55 = vmul.f32 %v951_v49, %v1814_v26  ;;  %v901_v56 = vpop.permute.xlu0 %900 }
 0x4fe   : > { %v903_v59 = vpop.permute.xlu1 %902 }
 0x4ff   : > { %v1572_v54 = vpack.c.bf16 %v958_v0, %v956_v50  ;;  %v904_v61 = vsel %vm342_vm5, %v901_v56, %v903_v59  ;;  %v905_v62 = vsel %vm342_vm5, %v903_v59, %v901_v56  ;;  %v1570_v63 = vpack.c.bf16 %v959_v55, %v957_v52 }
 0x500   : > { %v938_v3 = vrot.slane %v904_v61, 4  ;;  %v939_v4 = vrot.slane %v905_v62, 4 }
 0x501   : > { %1571 = vmatprep.subr.bf16.mxu1 %v1570_v63  ;;  %v913_v1 = vpop.permute.xlu0 %912 }
 0x502   : > { %v915_v5 = vpop.permute.xlu1 %914  ;;  %1573 = vmatpush1.bf16.msra.mxu1 %v1572_v54  ;;  %v952_v11 = vsel %vm390_vm3, %v2095_v19, %v938_v3  ;;  %v953_v13 = vsel %vm390_vm3, %v2097_v20, %v939_v4 }
 0x503   : > { %v916_v7 = vsel %vm356_vm6, %v913_v1, %v915_v5  ;;  %v917_v9 = vsel %vm356_vm6, %v915_v5, %v913_v1  ;;  %v960_v24 = vmul.f32 %v952_v11, %v1871_v60  ;;  %v961_v27 = vmul.f32 %v953_v13, %v1852_v51 }
 0x504   : > { %v944_v14 = vrot.slane %v916_v7, 4  ;;  %v945_v15 = vrot.slane %v917_v9, 4 }
 0x505   : > { %v907_v10 = vpop.permute.xlu0 %906 }
 0x506   : > { %v909_v16 = vpop.permute.xlu1 %908 }
 0x507   : > { %v910_v17 = vsel %vm349_vm7, %v907_v10, %v909_v16  ;;  %v911_v18 = vsel %vm349_vm7, %v909_v16, %v907_v10 }
 0x508   : > { %v954_v22 = vsel %vm390_vm3, %v910_v17, %v944_v14  ;;  %v955_v23 = vsel %vm390_vm3, %v911_v18, %v945_v15 }
 0x509   : > { %v962_v19 = vmul.f32 %v954_v22, %v1861_v57  ;;  %v963_v25 = vmul.f32 %v955_v23, %v1866_v58  ;;  %v919_v20 = vpop.permute.xlu0 %918 }
 0x50a   : > { %v921_v30 = vpop.permute.xlu1 %920 }
 0x50b   : > { %v1576_v33 = vpack.c.bf16 %v962_v19, %v960_v24  ;;  %v923_v34 = vsel %vm363_vm8, %v921_v30, %v919_v20  ;;  %v1574_v35 = vpack.c.bf16 %v963_v25, %v961_v27  ;;  %v922_v31 = vsel %vm363_vm8, %v919_v20, %v921_v30 }
 0x50c   : > { %v965_v36 = vmul.f32 %v923_v34, %v1886_v6  ;;  %v964_v32 = vmul.f32 %v922_v31, %v1892_v12 }
 0x50d   : > { %1575 = vmatprep.subr.bf16.mxu1 %v1574_v35 }
 0x50e   : > { %1577 = vmatpush1.bf16.msra.mxu1 %v1576_v33 }
 0x50f   : > { %1528 = vmatprep.subr.msk.mxu1 %vm390_vm3, %v965_v36 }
 0x512   : > { %1529 = vmatpush1.msk.msra.mxu1 %vm390_vm3, %v964_v32 }
 0x513   : > { %1530 = vmatmul.mubr.msk.f32.vlgmr.msra.gmra.mrb[2].mxu1 %vm416_vm9, %v1526_v37 }
 0x514   : > { %1422 = vmatprep.mubr.f32.mxu1 %v1668_v2  ;;  %v1533_v2 = vld [vmem:[%s2416_s2 + $0x8] sm:$0xf] }
 0x51a   : > { %v973_v38 = vpop.permute.xlu0 %972 }
 0x5e6   : > { %v1050_v39 = vpop.f32.mrb[2].mxu1 }
 0x5e7   : > { %v1051_v40 = vadd.f32 %v1050_v39, %v973_v38  ;;  %v1052_v41 = vpop.f32.mrb[3].mxu1 }
 0x5e8   : > { %v1053_v42 = vadd.f32 %v1052_v41, %v973_v38 }
 0x5ea   : > { %v1057_v43 = vcombine.low %v1051_v40, %v1053_v42 }
 0x5ec   : > { %v2194_v44 = vadd.f32 %v1057_v43, %v1995_v53 }
 0x5ee   : > { %1070 = vrot.lane.b32.xlu1 %v2194_v44, %s1663_s14  ;;  %v2200_v45 = vcombine.high %v2194_v44, %v2194_v44 }
 0x5f0   : > { %1072 = vrot.lane.b32.xlu0 %v2200_v45, %s1663_s14 }
 0x5f2   : > { %1082 = vrot.lane.b32.xlu1 %v2194_v44, %s1662_s13 }
 0x5f4   : > { %1084 = vrot.lane.b32.xlu0 %v2200_v45, %s1662_s13 }
 0x5f6   : > { %1064 = vrot.lane.b32.xlu1 %v2194_v44, %s1664_s15 }
 0x5f8   : > { %1066 = vrot.lane.b32.xlu0 %v2200_v45, %s1664_s15 }
 0x5fa   : > { %1076 = vrot.lane.b32.xlu1 %v2194_v44, %s1665_s16 }
 0x5fc   : > { %1078 = vrot.lane.b32.xlu0 %v2200_v45, %s1665_s16 }
 0x5fe   : > { %1088 = vrot.lane.b32.xlu1 %v2194_v44, %s1666_s17 }
 0x600   : > { %1090 = vrot.lane.b32.xlu0 %v2200_v45, %s1666_s17 }
 0x602   : > { %1100 = vrot.lane.b32.xlu1 %v2194_v44, %s1667_s18 }
 0x604   : > { %1102 = vrot.lane.b32.xlu0 %v2200_v45, %s1667_s18 }
 0x606   : > { %1094 = vrot.lane.b32.xlu1 %v2194_v44, %s1669_s19 }
 0x608   : > { %1096 = vrot.lane.b32.xlu0 %v2200_v45, %s1669_s19 }
 0x60a   : > { %1106 = vrot.lane.b32.xlu1 %v2194_v44, %s1671_s20 }
 0x60c   : > { %1108 = vrot.lane.b32.xlu0 %v2200_v45, %s1671_s20 }
 0x60e   : > { %1160 = vperm.xlu1 %1624, %v1533_v2  }
 0x660   : > { %v1071_v53 = vpop.permute.xlu1 %1070 }
 0x662   : > { %v1073_v46 = vpop.permute.xlu0 %1072 }
 0x663   : > { %v1074_v50 = vsel %vm321_vm1, %v1071_v53, %v1073_v46  ;;  %v1075_v52 = vsel %vm321_vm1, %v1073_v46, %v1071_v53 }
 0x664   : > { %v1083_v47 = vpop.permute.xlu1 %1082  ;;  %v1114_v61 = vrot.slane %v1075_v52, 4  ;;  %v1115_v62 = vrot.slane %v1074_v50, 4  ;;  %v1245_v52 = vstv %s1531_s10 }
 0x666   : > { %v1085_v48 = vpop.permute.xlu0 %1084 }
 0x667   : > { %v1086_v55 = vsel %vm335_vm0, %v1083_v47, %v1085_v48  ;;  %v1087_v56 = vsel %vm335_vm0, %v1085_v48, %v1083_v47 }
 0x668   : > { %v1065_v49 = vpop.permute.xlu1 %1064  ;;  %v1120_v1 = vrot.slane %v1087_v56, 4  ;;  %v1121_v3 = vrot.slane %v1086_v55, 4 }
 0x66a   : > { %v1067_v0 = vpop.permute.xlu0 %1066 }
 0x66b   : > { %v1068_v59 = vsel %vm314_vm2, %v1065_v49, %v1067_v0  ;;  %v1069_v54 = vsel %vm314_vm2, %v1067_v0, %v1065_v49 }
 0x66c   : > { %v1077_v63 = vpop.permute.xlu1 %1076  ;;  %v1136_v4 = vsel %vm390_vm3, %v1069_v54, %v1114_v61  ;;  %v1137_v5 = vsel %vm390_vm3, %v1068_v59, %v1115_v62 }
 0x66d   : > { %v1144_v15 = vmul.f32 %v1136_v4, %v1820_v28  ;;  %v1145_v16 = vmul.f32 %v1137_v5, %v1809_v21 }
 0x66e   : > { %v1079_v7 = vpop.permute.xlu0 %1078 }
 0x66f   : > { %v1080_v9 = vsel %vm328_vm4, %v1077_v63, %v1079_v7  ;;  %v1081_v10 = vsel %vm328_vm4, %v1079_v7, %v1077_v63  ;;  %v1538_v63 = vld [vmem:[%s2418_s4 + $0x8] sm:$0xf] }
 0x670   : > { %v1138_v11 = vsel %vm390_vm3, %v1081_v10, %v1120_v1  ;;  %v1139_v13 = vsel %vm390_vm3, %v1080_v9, %v1121_v3  ;;  %v1089_v14 = vpop.permute.xlu1 %1088 }
 0x671   : > { %v1146_v17 = vmul.f32 %v1138_v11, %v1825_v29  ;;  %v1147_v18 = vmul.f32 %v1139_v13, %v1814_v26 }
 0x672   : > { %v1091_v22 = vpop.permute.xlu0 %1090 }
 0x673   : > { %v1580_v23 = vpack.c.bf16 %v1146_v17, %v1144_v15  ;;  %v1092_v24 = vsel %vm342_vm5, %v1089_v14, %v1091_v22  ;;  %v1093_v19 = vsel %vm342_vm5, %v1091_v22, %v1089_v14  ;;  %v1578_v25 = vpack.c.bf16 %v1147_v18, %v1145_v16 }
 0x674   : > { %v1101_v20 = vpop.permute.xlu1 %1100  ;;  %v1126_v27 = vrot.slane %v1092_v24, 4  ;;  %v1127_v30 = vrot.slane %v1093_v19, 4 }
 0x675   : > { %1579 = vmatprep.subr.bf16.mxu0 %v1578_v25 }
 0x676   : > { %1581 = vmatpush1.bf16.msra.mxu0 %v1580_v23  ;;  %v1103_v28 = vpop.permute.xlu0 %1102  ;;  %v1140_v33 = vsel %vm390_vm3, %v2194_v44, %v1126_v27  ;;  %v1141_v34 = vsel %vm390_vm3, %v2200_v45, %v1127_v30 }
 0x677   : > { %v1104_v21 = vsel %vm356_vm6, %v1101_v20, %v1103_v28  ;;  %v1105_v26 = vsel %vm356_vm6, %v1103_v28, %v1101_v20  ;;  %v1148_v40 = vmul.f32 %v1140_v33, %v1871_v60  ;;  %v1149_v43 = vmul.f32 %v1141_v34, %v1852_v51  ;;  %v1532_v51 = vld [vmem:[%s2415_s1 + $0x8] sm:$0xf] }
 0x678   : > { %v1095_v29 = vpop.permute.xlu1 %1094  ;;  %v1132_v35 = vrot.slane %v1104_v21, 4  ;;  %v1133_v36 = vrot.slane %v1105_v26, 4  ;;  %v1626_v26 = vld [vmem:[%s2419_s5] sm:$0xff]  ;;  %v1627_v33 = vld [vmem:[%s2419_s5 + $0x8] sm:$0xff] }
 0x67a   : > { %v1097_v31 = vpop.permute.xlu0 %1096 }
 0x67b   : > { %v1098_v32 = vsel %vm349_vm7, %v1095_v29, %v1097_v31  ;;  %v1099_v37 = vsel %vm349_vm7, %v1097_v31, %v1095_v29  ;;  %v1629_v31 = vld [vmem:[%s2419_s5 + $0x18] sm:$0xff] }
 0x67c   : > { %v1142_v38 = vsel %vm390_vm3, %v1098_v32, %v1132_v35  ;;  %v1143_v39 = vsel %vm390_vm3, %v1099_v37, %v1133_v36  ;;  %v1107_v45 = vpop.permute.xlu1 %1106  ;;  %v1628_v35 = vld [vmem:[%s2419_s5 + $0x10] sm:$0xff] }
 0x67d   : > { %v1150_v41 = vmul.f32 %v1142_v38, %v1861_v57  ;;  %v1151_v42 = vmul.f32 %v1143_v39, %v1866_v58 }
 0x67e   : > { %v1109_v2 = vpop.permute.xlu0 %1108 }
 0x67f   : > { %v1584_v53 = vpack.c.bf16 %v1150_v41, %v1148_v40  ;;  %v1111_v46 = vsel %vm363_vm8, %v1109_v2, %v1107_v45  ;;  %v1582_v47 = vpack.c.bf16 %v1151_v42, %v1149_v43  ;;  %v1110_v49 = vsel %vm363_vm8, %v1107_v45, %v1109_v2 }
 0x680   : > { %v1153_v48 = vmul.f32 %v1111_v46, %v1886_v6  ;;  %v1152_v57 = vmul.f32 %v1110_v49, %v1892_v12 }
 0x681   : > { %1583 = vmatprep.subr.bf16.mxu0 %v1582_v47 }
 0x682   : > { %1585 = vmatpush1.bf16.msra.mxu0 %v1584_v53 }
 0x683   : > { %1534 = vmatprep.subr.msk.mxu0 %vm390_vm3, %v1153_v48 }
 0x686   : > { %1535 = vmatpush1.msk.msra.mxu0 %vm390_vm3, %v1152_v57 }
 0x687   : > { %1536 = vmatmul.mubr.msk.f32.vlgmr.msra.gmra.mrb[4].mxu0 %vm416_vm9, %v1532_v51 }
 0x68d   : > { %v1161_v58 = vpop.permute.xlu1 %1160 }
 0x75a   : > { %v1238_v50 = vpop.f32.mrb[4].mxu0 }
 0x75b   : > { %v1239_v0 = vadd.f32 %v1238_v50, %v1161_v58  ;;  %v1240_v55 = vpop.f32.mrb[5].mxu0 }
 0x75c   : > { %v1241_v56 = vadd.f32 %v1240_v55, %v1161_v58 }
 0x75d   : > { %vm1243_vm14 = vcmp.gt.f32.partialorder %v1239_v0, 0.0  ;;  %v1246_v59 = vmul.f32 %v1245_v52, %v1239_v0 }
 0x75e   : > { %vm1244_vm15 = vcmp.gt.f32.partialorder %v1241_v56, 0.0  ;;  %v1247_v54 = vmul.f32 %v1245_v52, %v1241_v56 }
 0x75f   : > { %v2293_v61 = vsel %vm1243_vm14, %v1239_v0, %v1246_v59 }
 0x760   : > { %v2295_v62 = vsel %vm1244_vm15, %v1241_v56, %v1247_v54  ;;  %1256 = vrot.lane.b32.xlu0 %v2293_v61, %s1663_s14  ;;  %v1630_v54 = vld [vmem:[%s2419_s5 + $0x30] sm:$0xff] }
 0x761   : > { %1258 = vrot.lane.b32.xlu1 %v2295_v62, %s1663_s14  ;;  %s292_s14 = scalar_lea.vmem %s2421_s7, %s1544_s9 }
 0x764   : > { %1268 = vrot.lane.b32.xlu0 %v2293_v61, %s1662_s13 }
 0x765   : > { %1270 = vrot.lane.b32.xlu1 %v2295_v62, %s1662_s13 }
 0x768   : > { %1250 = vrot.lane.b32.xlu0 %v2293_v61, %s1664_s15 }
 0x769   : > { %1252 = vrot.lane.b32.xlu1 %v2295_v62, %s1664_s15 }
 0x76c   : > { %1262 = vrot.lane.b32.xlu0 %v2293_v61, %s1665_s16 }
 0x76d   : > { %1264 = vrot.lane.b32.xlu1 %v2295_v62, %s1665_s16 }
 0x770   : > { %1274 = vrot.lane.b32.xlu0 %v2293_v61, %s1666_s17 }
 0x771   : > { %1276 = vrot.lane.b32.xlu1 %v2295_v62, %s1666_s17 }
 0x774   : > { %1286 = vrot.lane.b32.xlu0 %v2293_v61, %s1667_s18 }
 0x775   : > { %1288 = vrot.lane.b32.xlu1 %v2295_v62, %s1667_s18 }
 0x778   : > { %1280 = vrot.lane.b32.xlu0 %v2293_v61, %s1669_s19 }
 0x779   : > { %1282 = vrot.lane.b32.xlu1 %v2295_v62, %s1669_s19 }
 0x77c   : > { %1292 = vrot.lane.b32.xlu0 %v2293_v61, %s1671_s20 }
 0x77d   : > { %1294 = vrot.lane.b32.xlu1 %v2295_v62, %s1671_s20 }
 0x780   : > { %1346 = vperm.xlu0 %1623, %v1538_v63  }
 0x7d2   : > { %v1257_v1 = vpop.permute.xlu0 %1256 }
 0x7d3   : > { %v1259_v3 = vpop.permute.xlu1 %1258 }
 0x7d4   : > { %v1260_v7 = vsel %vm321_vm1, %v1257_v1, %v1259_v3  ;;  %v1261_v9 = vsel %vm321_vm1, %v1259_v3, %v1257_v1  ;;  %v1632_v3 = vld [vmem:[%s2419_s5 + $0x28] sm:$0xff] }
 0x7d5   : > { %v1300_v17 = vrot.slane %v1261_v9, 4  ;;  %v1301_v18 = vrot.slane %v1260_v7, 4 }
 0x7d6   : > { %v1269_v4 = vpop.permute.xlu0 %1268 }
 0x7d7   : > { %v1271_v5 = vpop.permute.xlu1 %1270 }
 0x7d8   : > { %v1272_v13 = vsel %vm335_vm0, %v1269_v4, %v1271_v5  ;;  %v1273_v14 = vsel %vm335_vm0, %v1271_v5, %v1269_v4 }
 0x7d9   : > { %v1306_v23 = vrot.slane %v1273_v14, 4  ;;  %v1307_v24 = vrot.slane %v1272_v13, 4  ;;  %v1537_v14 = vld [vmem:[%s2417_s3 + $0x8] sm:$0xf] }
 0x7da   : > { %v1251_v10 = vpop.permute.xlu0 %1250 }
 0x7db   : > { %v1253_v11 = vpop.permute.xlu1 %1252 }
 0x7dc   : > { %v1254_v15 = vsel %vm314_vm2, %v1251_v10, %v1253_v11  ;;  %v1255_v16 = vsel %vm314_vm2, %v1253_v11, %v1251_v10 }
 0x7dd   : > { %v1322_v19 = vsel %vm390_vm3, %v1255_v16, %v1300_v17  ;;  %v1323_v25 = vsel %vm390_vm3, %v1254_v15, %v1301_v18 }
 0x7de   : > { %v1263_v22 = vpop.permute.xlu0 %1262  ;;  %v1330_v29 = vmul.f32 %v1626_v26, %v1322_v19  ;;  %v1331_v34 = vmul.f32 %v1627_v33, %v1323_v25 }
 0x7df   : > { %v1265_v20 = vpop.permute.xlu1 %1264 }
 0x7e0   : > { %v1266_v27 = vsel %vm328_vm4, %v1263_v22, %v1265_v20  ;;  %v1267_v30 = vsel %vm328_vm4, %v1265_v20, %v1263_v22 }
 0x7e1   : > { %v1324_v28 = vsel %vm390_vm3, %v1267_v30, %v1306_v23  ;;  %v1325_v21 = vsel %vm390_vm3, %v1266_v27, %v1307_v24 }
 0x7e2   : > { %v1332_v36 = vmul.f32 %v1628_v35, %v1324_v28  ;;  %v1333_v32 = vmul.f32 %v1629_v31, %v1325_v21  ;;  %v1275_v37 = vpop.permute.xlu0 %1274 }
 0x7e3   : > { %v1277_v38 = vpop.permute.xlu1 %1276 }
 0x7e4   : > { %v1588_v39 = vpack.c.bf16 %v1332_v36, %v1330_v29  ;;  %v1278_v40 = vsel %vm342_vm5, %v1275_v37, %v1277_v38  ;;  %v1279_v41 = vsel %vm342_vm5, %v1277_v38, %v1275_v37  ;;  %v1586_v42 = vpack.c.bf16 %v1333_v32, %v1331_v34 }
 0x7e5   : > { %v1312_v45 = vrot.slane %v1278_v40, 4  ;;  %v1313_v2 = vrot.slane %v1279_v41, 4 }
 0x7e6   : > { %1587 = vmatprep.subr.bf16.mxu1 %v1586_v42  ;;  %v1287_v43 = vpop.permute.xlu0 %1286 }
 0x7e7   : > { %v1289_v53 = vpop.permute.xlu1 %1288  ;;  %1589 = vmatpush1.bf16.msra.mxu1 %v1588_v39  ;;  %v1326_v49 = vsel %vm390_vm3, %v2293_v61, %v1312_v45  ;;  %v1327_v57 = vsel %vm390_vm3, %v2295_v62, %v1313_v2  ;;  %v1631_v62 = vld [vmem:[%s2419_s5 + $0x38] sm:$0xff] }
 0x7e8   : > { %v1290_v46 = vsel %vm356_vm6, %v1287_v43, %v1289_v53  ;;  %v1291_v47 = vsel %vm356_vm6, %v1289_v53, %v1287_v43  ;;  %v1334_v59 = vmul.f32 %v1326_v49, %v1871_v60  ;;  %v1335_v4 = vmul.f32 %v1632_v3, %v1327_v57 }
 0x7e9   : > { %v1318_v51 = vrot.slane %v1290_v46, 4  ;;  %v1319_v58 = vrot.slane %v1291_v47, 4 }
 0x7ea   : > { %v1281_v48 = vpop.permute.xlu0 %1280 }
 0x7eb   : > { %v1283_v50 = vpop.permute.xlu1 %1282 }
 0x7ec   : > { %v1284_v52 = vsel %vm349_vm7, %v1281_v48, %v1283_v50  ;;  %v1285_v0 = vsel %vm349_vm7, %v1283_v50, %v1281_v48 }
 0x7ed   : > { %v1328_v55 = vsel %vm390_vm3, %v1284_v52, %v1318_v51  ;;  %v1329_v56 = vsel %vm390_vm3, %v1285_v0, %v1319_v58 }
 0x7ee   : > { %v1336_v61 = vmul.f32 %v1630_v54, %v1328_v55  ;;  %v1337_v63 = vmul.f32 %v1631_v62, %v1329_v56  ;;  %v1293_v1 = vpop.permute.xlu0 %1292 }
 0x7ef   : > { %v1295_v5 = vpop.permute.xlu1 %1294 }
 0x7f0   : > { %v1592_v7 = vpack.c.bf16 %v1336_v61, %v1334_v59  ;;  %v1297_v60 = vsel %vm363_vm8, %v1295_v5, %v1293_v1  ;;  %v1590_v9 = vpack.c.bf16 %v1337_v63, %v1335_v4  ;;  %v1296_v11 = vsel %vm363_vm8, %v1293_v1, %v1295_v5 }
 0x7f1   : > { %v1339_v10 = vmul.f32 %v1297_v60, %v1886_v6  ;;  %v1338_v13 = vmul.f32 %v1296_v11, %v1892_v12  ;;  %v1633_v12 = vld [vmem:[%s1742_s12] sm:$0xff] }
 0x7f2   : > { %1591 = vmatprep.subr.bf16.mxu1 %v1590_v9 }
 0x7f3   : > { %1593 = vmatpush1.bf16.msra.mxu1 %v1592_v7 }
 0x7f4   : > { %1539 = vmatprep.subr.msk.mxu1 %vm390_vm3, %v1339_v10 }
 0x7f7   : > { %1540 = vmatpush1.msk.msra.mxu1 %vm390_vm3, %v1338_v13 }
 0x7f8   : > { %1541 = vmatmul.mubr.msk.f32.vlgmr.msra.gmra.mrb[4].mxu1 %vm416_vm9, %v1537_v14 }
 0x7ff   : > { %v1347_v6 = vpop.permute.xlu0 %1346 }
 0x8cb   : > { %v1424_v15 = vpop.f32.mrb[4].mxu1 }
 0x8cc   : > { %v1425_v8 = vadd.f32 %v1424_v15, %v1347_v6  ;;  %v1426_v16 = vpop.f32.mrb[5].mxu1 }
 0x8cd   : > { %v1427_v17 = vadd.f32 %v1426_v16, %v1347_v6 }
 0x8cf   : > { %v1431_v18 = vcombine.low %v1425_v8, %v1427_v17 }
 0x8d1   : > { %v1433_v22 = vadd.f32 %v1431_v18, %v2194_v44 }
 0x8d3   : > { %v1434_v23 = vadd.f32 %v1633_v12, %v1433_v22 }
 0x8d5   : > { %1435 = vst [vmem:[%s292_s14] sm:$0xff] %v1434_v23 }
 0x8d6 PF: > { %s18_s24 = sadd.s32 1, %s1659_s24  }
 0x8d7   : > { %p15_p1 = scmp.ge.s32.totalorder %s18_s24, 4  }
 0x8d9   :  { %17 = sbr.rel (!%p15_p1) target bundleno = 1 (0x1), region = 91 }
 0x8e0   :  { %1457 = vsyncpa [#allocation3], 1 }
 0x8e1   :  { %1459 = vsyncpa [#allocation3 + $0x1], 1 }

</bundles_post_ra>
